<compile_context>
chip_gen: v5e
topology: v5e:2x2
jax: 0.10.0
libtpu: 0.0.40
codegen_flags: <defaults>
</compile_context>

<pallas_src>
import functools

import jax
import jax.numpy as jnp
import numpy as np
from jax.experimental import pallas as pl
from jax.experimental.pallas import tpu as pltpu

_EPS = 1e-5


# ----------------------------- Pallas kernels ------------------------------ #

def _conv_stats_kernel(xp_ref, w_ref, sel_ref, y_ref, stat_ref):
    """3x3 conv folded into a single (H, 3*WC) @ (3*WC, WC) matmul + per-image channel stats."""
    h = y_ref.shape[1]
    xp = xp_ref[0]                                                   # (H+2, WC) padded rows
    xcat = jnp.concatenate([xp[0:h, :], xp[1:h + 1, :], xp[2:h + 2, :]], axis=-1)
    y = jnp.dot(xcat, w_ref[...], preferred_element_type=jnp.float32)  # (H, WC), lane-dense
    y_ref[0] = y
    # Per-channel sum / sumsq for this image: reduce rows on the VPU/XLU, then reduce the
    # x positions inside the lane dim with a selector matmul on the MXU (no in-kernel reshape).
    cs = jnp.sum(y, axis=0, keepdims=True)                           # (1, WC)
    cq = jnp.sum(y * y, axis=0, keepdims=True)                       # (1, WC)
    stat_ref[0] = jnp.concatenate(
        [jnp.dot(cs, sel_ref[...], preferred_element_type=jnp.float32),
         jnp.dot(cq, sel_ref[...], preferred_element_type=jnp.float32)],
        axis=0)                                                      # (2, CP)


def _bn_prelu_conv_stats_kernel(y1_ref, st1_ref, g_ref, b_ref, a_ref, exp_ref,
                                w_ref, sel_ref, y2_ref, stat_ref, *, inv_count, eps):
    """BN1 finalize + PReLU + second 3x3 conv (folded matmul) + per-image channel stats."""
    h = y1_ref.shape[1]
    wc = y1_ref.shape[2]
    # --- BN1 finalize (tiny; recomputed per grid step from the global per-image sums) ------
    tot = jnp.sum(st1_ref[...], axis=0)                              # (2, CP)
    mean_c = tot[0:1, :] * inv_count
    var_c = tot[1:2, :] * inv_count - mean_c * mean_c                # biased variance
    scale_c = g_ref[...] * jax.lax.rsqrt(var_c + eps)                # (1, CP)
    shift_c = b_ref[...] - mean_c * scale_c
    # Broadcast per-channel scale/shift to the lane layout with the expander matmul.
    scale_l = jnp.dot(scale_c, exp_ref[...], preferred_element_type=jnp.float32)  # (1, WC)
    shift_l = jnp.dot(shift_c, exp_ref[...], preferred_element_type=jnp.float32)
    # --- normalize + PReLU (alpha is a scalar from SMEM) ------------------------------------
    y1 = y1_ref[0] * scale_l + shift_l                               # (H, WC)
    alpha = a_ref[0]
    y1 = jnp.where(y1 >= 0.0, y1, alpha * y1)
    # --- conv2: add the zero halo rows in-kernel, fold taps into one matmul -----------------
    zrow = jnp.zeros((1, wc), jnp.float32)
    yp = jnp.concatenate([zrow, y1, zrow], axis=0)                   # (H+2, WC)
    xcat = jnp.concatenate([yp[0:h, :], yp[1:h + 1, :], yp[2:h + 2, :]], axis=-1)
    y2 = jnp.dot(xcat, w_ref[...], preferred_element_type=jnp.float32)
    y2_ref[0] = y2
    cs = jnp.sum(y2, axis=0, keepdims=True)
    cq = jnp.sum(y2 * y2, axis=0, keepdims=True)
    stat_ref[0] = jnp.concatenate(
        [jnp.dot(cs, sel_ref[...], preferred_element_type=jnp.float32),
         jnp.dot(cq, sel_ref[...], preferred_element_type=jnp.float32)],
        axis=0)


def _bn_residual_kernel(y2_ref, st2_ref, g_ref, b_ref, exp_ref, res_ref, out_ref,
                        *, inv_count, eps):
    """BN2 finalize + residual add (lane-dense elementwise epilogue)."""
    tot = jnp.sum(st2_ref[...], axis=0)
    mean_c = tot[0:1, :] * inv_count
    var_c = tot[1:2, :] * inv_count - mean_c * mean_c
    scale_c = g_ref[...] * jax.lax.rsqrt(var_c + eps)
    shift_c = b_ref[...] - mean_c * scale_c
    scale_l = jnp.dot(scale_c, exp_ref[...], preferred_element_type=jnp.float32)
    shift_l = jnp.dot(shift_c, exp_ref[...], preferred_element_type=jnp.float32)
    out_ref[0] = y2_ref[0] * scale_l + shift_l + res_ref[0]


# ----------------------------- pallas_call glue ----------------------------- #

def _call_conv_stats(xp, wcat, sel, n, h, wc, cp):
    return pl.pallas_call(
        _conv_stats_kernel,
        out_shape=(jax.ShapeDtypeStruct((n, h, wc), jnp.float32),
                   jax.ShapeDtypeStruct((n, 2, cp), jnp.float32)),
        grid_spec=pltpu.PrefetchScalarGridSpec(
            num_scalar_prefetch=0,
            grid=(n,),
            in_specs=[
                pl.BlockSpec((1, h + 2, wc), lambda i: (i, 0, 0)),   # H-padded rows (lane-dense)
                pl.BlockSpec((3 * wc, wc), lambda i: (0, 0)),        # banded weight (DMA'd once)
                pl.BlockSpec((wc, cp), lambda i: (0, 0)),            # lane -> channel selector
            ],
            out_specs=[
                pl.BlockSpec((1, h, wc), lambda i: (i, 0, 0)),       # raw conv output
                pl.BlockSpec((1, 2, cp), lambda i: (i, 0, 0)),       # per-image [sum; sumsq]
            ],
        ),
        compiler_params=pltpu.CompilerParams(dimension_semantics=("parallel",)),
    )(xp, wcat, sel)


def _call_bn_prelu_conv_stats(y1, st1, g, b, alpha, expand, wcat, sel,
                              n, h, wc, cp, inv_count):
    kern = functools.partial(_bn_prelu_conv_stats_kernel, inv_count=inv_count, eps=_EPS)
    return pl.pallas_call(
        kern,
        out_shape=(jax.ShapeDtypeStruct((n, h, wc), jnp.float32),
                   jax.ShapeDtypeStruct((n, 2, cp), jnp.float32)),
        grid_spec=pltpu.PrefetchScalarGridSpec(
            num_scalar_prefetch=0,
            grid=(n,),
            in_specs=[
                pl.BlockSpec((1, h, wc), lambda i: (i, 0, 0)),       # raw conv1 (this image)
                pl.BlockSpec((n, 2, cp), lambda i: (0, 0, 0)),       # all per-image conv1 stats
                pl.BlockSpec((1, cp), lambda i: (0, 0)),             # gamma1 (channel-padded)
                pl.BlockSpec((1, cp), lambda i: (0, 0)),             # beta1
                pl.BlockSpec(memory_space=pltpu.MemorySpace.SMEM),   # PReLU alpha (scalar)
                pl.BlockSpec((cp, wc), lambda i: (0, 0)),            # channel -> lane expander
                pl.BlockSpec((3 * wc, wc), lambda i: (0, 0)),        # banded conv2 weight
                pl.BlockSpec((wc, cp), lambda i: (0, 0)),            # selector
            ],
            out_specs=[
                pl.BlockSpec((1, h, wc), lambda i: (i, 0, 0)),
                pl.BlockSpec((1, 2, cp), lambda i: (i, 0, 0)),
            ],
        ),
        compiler_params=pltpu.CompilerParams(dimension_semantics=("parallel",)),
    )(y1, st1, g, b, alpha, expand, wcat, sel)


def _call_bn_residual(y2, st2, g, b, expand, res, n, h, wc, cp, inv_count):
    kern = functools.partial(_bn_residual_kernel, inv_count=inv_count, eps=_EPS)
    return pl.pallas_call(
        kern,
        out_shape=jax.ShapeDtypeStruct((n, h, wc), jnp.float32),
        grid_spec=pltpu.PrefetchScalarGridSpec(
            num_scalar_prefetch=0,
            grid=(n,),
            in_specs=[
                pl.BlockSpec((1, h, wc), lambda i: (i, 0, 0)),       # raw conv2
                pl.BlockSpec((n, 2, cp), lambda i: (0, 0, 0)),       # all per-image conv2 stats
                pl.BlockSpec((1, cp), lambda i: (0, 0)),             # gamma2
                pl.BlockSpec((1, cp), lambda i: (0, 0)),             # beta2
                pl.BlockSpec((cp, wc), lambda i: (0, 0)),            # expander
                pl.BlockSpec((1, h, wc), lambda i: (i, 0, 0)),       # residual (original x)
            ],
            out_specs=pl.BlockSpec((1, h, wc), lambda i: (i, 0, 0)),
        ),
        compiler_params=pltpu.CompilerParams(dimension_semantics=("parallel",)),
    )(y2, st2, g, b, expand, res)


# ------------------------------ weight folding ------------------------------ #

def _banded_conv_weight(w_hwio, w_spatial):
    """Fold a (3,3,Cin,Cout) HWIO conv weight into a banded (3*W*C, W*C) matrix.

    Row index = ky*(W*C) + xi*C + ci ; col index = xo*C + co ;
    entry = w[ky, xi-xo+1, ci, co] when xi-xo+1 in {0,1,2}, else 0 (this also encodes the
    zero padding along x). One-time weight preprocessing in the wrapper.
    """
    c = w_hwio.shape[2]
    xi = jnp.arange(w_spatial)[:, None]
    xo = jnp.arange(w_spatial)[None, :]
    kx = xi - xo + 1
    valid = (kx >= 0) & (kx <= 2)
    wk = w_hwio[:, jnp.clip(kx, 0, 2), :, :]                  # (3, W, W, C, C): [ky, xi, xo, ci, co]
    wk = jnp.where(valid[None, :, :, None, None], wk, 0.0)
    wk = jnp.transpose(wk, (0, 1, 3, 2, 4))                   # (ky, xi, ci, xo, co)
    return wk.reshape(3 * w_spatial * c, w_spatial * c)


# ------------------------------ module wrapper ------------------------------ #

@jax.jit
def residual_block_forward(x_nchw, w1, g1, b1, a1, w2, g2, b2):
    """_ResidualBlock.forward. x_nchw: (N,C,H,W); w*: HWIO (3,3,C,C); g/b: (C,); a1: scalar."""
    n, c, h, w = x_nchw.shape
    wc = w * c                                   # lane width of the row layout (128 in the test)
    cp = -(-c // 128) * 128                      # channel lanes for the small stat/param tiles
    inv_count = 1.0 / float(n * h * w)

    x_nhwc = jnp.transpose(x_nchw, (0, 2, 3, 1)).astype(jnp.float32)
    x_rows = x_nhwc.reshape(n, h, wc)                                    # residual, lane-dense
    xp_rows = jnp.pad(x_nhwc, ((0, 0), (1, 1), (0, 0), (0, 0))).reshape(n, h + 2, wc)

    # One-time weight / selector preprocessing (glue, O(W^2 C^2) tiny constants).
    wcat1 = _banded_conv_weight(w1.astype(jnp.float32), w)
    wcat2 = _banded_conv_weight(w2.astype(jnp.float32), w)
    # TODO(synk): on v5e/v6e cast wcat*/activations to bfloat16 (keep f32 accumulation) to
    # halve HBM traffic on the bandwidth-bound matmul path; kept f32 to hold the 1e-3 check.
    lane_ch = jnp.tile(jnp.arange(c), w)                                 # channel id of each lane
    sel = (lane_ch[:, None] == jnp.arange(cp)[None, :]).astype(jnp.float32)   # (WC, CP) reduce
    expand = sel.T                                                       # (CP, WC) broadcast

    def pad_c(v):
        return jnp.pad(v.astype(jnp.float32).reshape(1, c), ((0, 0), (0, cp - c)))

    g1p, b1p, g2p, b2p = pad_c(g1), pad_c(b1), pad_c(g2), pad_c(b2)
    alpha = jnp.reshape(a1, (1,)).astype(jnp.float32)

    # conv_1 (+ per-image channel stats)
    y1_raw, st1 = _call_conv_stats(xp_rows, wcat1, sel, n, h, wc, cp)
    # bn_1 -> PReLU -> conv_2 (+ per-image channel stats), all fused in one kernel
    y2_raw, st2 = _call_bn_prelu_conv_stats(
        y1_raw, st1, g1p, b1p, alpha, expand, wcat2, sel, n, h, wc, cp, inv_count)
    # bn_2 -> + residual
    out_rows = _call_bn_residual(
        y2_raw, st2, g2p, b2p, expand, x_rows, n, h, wc, cp, inv_count)

    out = out_rows.reshape(n, h, w, c)
    return jnp.transpose(out, (0, 3, 1, 2))      # back to NCHW


# ------------------------------ pure-JAX reference --------------------------- #

def _reference_forward(x_nchw, w1, g1, b1, a1, w2, g2, b2):
    x = jnp.transpose(x_nchw, (0, 2, 3, 1)).astype(jnp.float32)

    def conv(y, wgt):
        return jax.lax.conv_general_dilated(
            y, wgt, window_strides=(1, 1), padding=((1, 1), (1, 1)),
            dimension_numbers=("NHWC", "HWIO", "NHWC"))

    def bn(y, g, b):
        m = jnp.mean(y, axis=(0, 1, 2), keepdims=True)
        v = jnp.mean(jnp.square(y - m), axis=(0, 1, 2), keepdims=True)
        return (y - m) / jnp.sqrt(v + _EPS) * g.reshape(1, 1, 1, -1) + b.reshape(1, 1, 1, -1)

    y = conv(x, w1)
    y = bn(y, g1, b1)
    y = jnp.where(y >= 0, y, a1 * y)
    y = conv(y, w2)
    y = bn(y, g2, b2)
    return jnp.transpose(y + x, (0, 3, 1, 2))


# ----------------------------------- main ----------------------------------- #

if __name__ == "__main__":
    # Shapes implied by the module: stride=1, padding=1, in_channels == out_channels
    # (required for `output += r_tensor`).  W*C = 128 makes the row layout lane-dense.
    N, C, H, W = 2, 8, 16, 16

    key = jax.random.PRNGKey(0)
    kx, kw1, kw2, kg1, kb1, kg2, kb2 = jax.random.split(key, 7)

    x = jax.random.normal(kx, (N, C, H, W), jnp.float32)
    w1 = 0.1 * jax.random.normal(kw1, (3, 3, C, C), jnp.float32)   # HWIO
    w2 = 0.1 * jax.random.normal(kw2, (3, 3, C, C), jnp.float32)
    g1 = 1.0 + 0.1 * jax.random.normal(kg1, (C,), jnp.float32)
    b1 = 0.1 * jax.random.normal(kb1, (C,), jnp.float32)
    g2 = 1.0 + 0.1 * jax.random.normal(kg2, (C,), jnp.float32)
    b2 = 0.1 * jax.random.normal(kb2, (C,), jnp.float32)
    a1 = jnp.float32(0.25)                                         # PyTorch PReLU default

    out = jax.block_until_ready(residual_block_forward(x, w1, g1, b1, a1, w2, g2, b2))
    ref = jax.block_until_ready(_reference_forward(x, w1, g1, b1, a1, w2, g2, b2))
    np.testing.assert_allclose(np.asarray(out), np.asarray(ref), rtol=1e-3, atol=1e-3)

    print("KERNEL_OK")
</pallas_src>

<mosaic_0001>
module attributes {stable_mosaic.version = 11 : i64} {
  func.func @_conv_stats_kernel(%arg0: i32, %arg1: memref<1x18x128xf32, #tpu.memory_space<vmem>>, %arg2: memref<384x128xf32, #tpu.memory_space<vmem>>, %arg3: memref<128x128xf32, #tpu.memory_space<vmem>>, %arg4: memref<1x16x128xf32, #tpu.memory_space<vmem>>, %arg5: memref<1x2x128xf32, #tpu.memory_space<vmem>>) attributes {dimension_semantics = [#tpu.dimension_semantics<parallel>], iteration_bounds = array<i64: 2>, scalar_prefetch = 0 : i64, scratch_operands = 0 : i64, tpu.core_type = #tpu.core_type<tc>, window_params = [{transform_indices = @transform_0, window_bounds = array<i64: 1, 18, 128>}, {pipeline_mode = #tpu.pipeline_mode<synchronous>, transform_indices = @transform_1, window_bounds = array<i64: 384, 128>}, {pipeline_mode = #tpu.pipeline_mode<synchronous>, transform_indices = @transform_2, window_bounds = array<i64: 128, 128>}, {transform_indices = @transform_3, window_bounds = array<i64: 1, 16, 128>}, {transform_indices = @transform_4, window_bounds = array<i64: 1, 2, 128>}]} {
    %c0 = arith.constant 0 : index
    %c0_0 = arith.constant 0 : index
    %c0_1 = arith.constant 0 : index
    %0 = vector.load %arg1[%c0, %c0_0, %c0_1] : memref<1x18x128xf32, #tpu.memory_space<vmem>>, vector<1x18x128xf32>
    %1 = vector.shape_cast %0 : vector<1x18x128xf32> to vector<18x128xf32>
    %2 = vector.extract_strided_slice %1 {offsets = [0, 0], sizes = [16, 128], strides = [1, 1]} : vector<18x128xf32> to vector<16x128xf32>
    %3 = vector.extract_strided_slice %1 {offsets = [1, 0], sizes = [16, 128], strides = [1, 1]} : vector<18x128xf32> to vector<16x128xf32>
    %4 = vector.extract_strided_slice %1 {offsets = [2, 0], sizes = [16, 128], strides = [1, 1]} : vector<18x128xf32> to vector<16x128xf32>
    %5 = tpu.concatenate %2, %3, %4 in 1 : vector<16x128xf32>, vector<16x128xf32>, vector<16x128xf32> -> vector<16x384xf32>
    %c0_2 = arith.constant 0 : index
    %c0_3 = arith.constant 0 : index
    %6 = vector.load %arg2[%c0_2, %c0_3] : memref<384x128xf32, #tpu.memory_space<vmem>>, vector<384x128xf32>
    %cst = arith.constant dense<0.000000e+00> : vector<16x128xf32>
    %7 = tpu.matmul %5, %6, %cst {dimension_numbers = #tpu.dot_dimension_numbers<[1], [0], [0], [1], [0, 0, 1, 1], [], []>} : vector<16x384xf32>, vector<384x128xf32>, vector<16x128xf32> -> vector<16x128xf32>
    %c0_4 = arith.constant 0 : index
    %c0_5 = arith.constant 0 : index
    %c0_6 = arith.constant 0 : index
    %8 = vector.load %arg4[%c0_4, %c0_5, %c0_6] : memref<1x16x128xf32, #tpu.memory_space<vmem>>, vector<1x16x128xf32>
    %9 = vector.shape_cast %8 : vector<1x16x128xf32> to vector<16x128xf32>
    %10 = vector.shape_cast %7 : vector<16x128xf32> to vector<1x16x128xf32>
    tpu.vector_store %arg4[%c0_4, %c0_5, %c0_6], %10 {strides = array<i32>} : memref<1x16x128xf32, #tpu.memory_space<vmem>>, vector<1x16x128xf32>,
    %cst_7 = arith.constant dense<0.000000e+00> : vector<128xf32>
    %11 = vector.multi_reduction <add>, %7, %cst_7 [0] : vector<16x128xf32> to vector<128xf32>
    %12 = vector.shape_cast %11 : vector<128xf32> to vector<1x128xf32>
    %13 = arith.mulf %7, %7 : vector<16x128xf32>
    %cst_8 = arith.constant dense<0.000000e+00> : vector<128xf32>
    %14 = vector.multi_reduction <add>, %13, %cst_8 [0] : vector<16x128xf32> to vector<128xf32>
    %15 = vector.shape_cast %14 : vector<128xf32> to vector<1x128xf32>
    %c0_9 = arith.constant 0 : index
    %c0_10 = arith.constant 0 : index
    %16 = vector.load %arg3[%c0_9, %c0_10] : memref<128x128xf32, #tpu.memory_space<vmem>>, vector<128x128xf32>
    %cst_11 = arith.constant dense<0.000000e+00> : vector<1x128xf32>
    %17 = tpu.matmul %12, %16, %cst_11 {dimension_numbers = #tpu.dot_dimension_numbers<[1], [0], [0], [1], [0, 0, 1, 1], [], []>} : vector<1x128xf32>, vector<128x128xf32>, vector<1x128xf32> -> vector<1x128xf32>
    %c0_12 = arith.constant 0 : index
    %c0_13 = arith.constant 0 : index
    %18 = vector.load %arg3[%c0_12, %c0_13] : memref<128x128xf32, #tpu.memory_space<vmem>>, vector<128x128xf32>
    %cst_14 = arith.constant dense<0.000000e+00> : vector<1x128xf32>
    %19 = tpu.matmul %15, %18, %cst_14 {dimension_numbers = #tpu.dot_dimension_numbers<[1], [0], [0], [1], [0, 0, 1, 1], [], []>} : vector<1x128xf32>, vector<128x128xf32>, vector<1x128xf32> -> vector<1x128xf32>
    %20 = tpu.concatenate %17, %19 in 0 : vector<1x128xf32>, vector<1x128xf32> -> vector<2x128xf32>
    %c0_15 = arith.constant 0 : index
    %c0_16 = arith.constant 0 : index
    %c0_17 = arith.constant 0 : index
    %21 = vector.load %arg5[%c0_15, %c0_16, %c0_17] : memref<1x2x128xf32, #tpu.memory_space<vmem>>, vector<1x2x128xf32>
    %22 = vector.shape_cast %21 : vector<1x2x128xf32> to vector<2x128xf32>
    %23 = vector.shape_cast %20 : vector<2x128xf32> to vector<1x2x128xf32>
    tpu.vector_store %arg5[%c0_15, %c0_16, %c0_17], %23 {strides = array<i32>} : memref<1x2x128xf32, #tpu.memory_space<vmem>>, vector<1x2x128xf32>,
    return
  }
  func.func @transform_0(%arg0: i32) -> (i32, i32, i32) {
    %c0_i32 = arith.constant 0 : i32
    %c0_i32_0 = arith.constant 0 : i32
    %c0_i32_1 = arith.constant 0 : i32
    return %arg0, %c0_i32, %c0_i32_0 : i32, i32, i32
  }
  func.func @transform_1(%arg0: i32) -> (i32, i32) {
    %c0_i32 = arith.constant 0 : i32
    %c0_i32_0 = arith.constant 0 : i32
    %c0_i32_1 = arith.constant 0 : i32
    return %c0_i32, %c0_i32_0 : i32, i32
  }
  func.func @transform_2(%arg0: i32) -> (i32, i32) {
    %c0_i32 = arith.constant 0 : i32
    %c0_i32_0 = arith.constant 0 : i32
    %c0_i32_1 = arith.constant 0 : i32
    return %c0_i32, %c0_i32_0 : i32, i32
  }
  func.func @transform_3(%arg0: i32) -> (i32, i32, i32) {
    %c0_i32 = arith.constant 0 : i32
    %c0_i32_0 = arith.constant 0 : i32
    %c0_i32_1 = arith.constant 0 : i32
    return %arg0, %c0_i32, %c0_i32_0 : i32, i32, i32
  }
  func.func @transform_4(%arg0: i32) -> (i32, i32, i32) {
    %c0_i32 = arith.constant 0 : i32
    %c0_i32_0 = arith.constant 0 : i32
    %c0_i32_1 = arith.constant 0 : i32
    return %arg0, %c0_i32, %c0_i32_0 : i32, i32, i32
  }
}

module attributes {stable_mosaic.version = 11 : i64} {
  func.func @_bn_prelu_conv_stats_kernel(%arg0: i32, %arg1: memref<1x16x128xf32, #tpu.memory_space<vmem>>, %arg2: memref<2x2x128xf32, #tpu.memory_space<vmem>>, %arg3: memref<1x128xf32, #tpu.memory_space<vmem>>, %arg4: memref<1x128xf32, #tpu.memory_space<vmem>>, %arg5: memref<1xf32, #tpu.memory_space<smem>>, %arg6: memref<128x128xf32, #tpu.memory_space<vmem>>, %arg7: memref<384x128xf32, #tpu.memory_space<vmem>>, %arg8: memref<128x128xf32, #tpu.memory_space<vmem>>, %arg9: memref<1x16x128xf32, #tpu.memory_space<vmem>>, %arg10: memref<1x2x128xf32, #tpu.memory_space<vmem>>) attributes {dimension_semantics = [#tpu.dimension_semantics<parallel>], iteration_bounds = array<i64: 2>, scalar_prefetch = 0 : i64, scratch_operands = 0 : i64, tpu.core_type = #tpu.core_type<tc>, window_params = [{transform_indices = @transform_0, window_bounds = array<i64: 1, 16, 128>}, {pipeline_mode = #tpu.pipeline_mode<synchronous>, transform_indices = @transform_1, window_bounds = array<i64: 2, 2, 128>}, {pipeline_mode = #tpu.pipeline_mode<synchronous>, transform_indices = @transform_2, window_bounds = array<i64: 1, 128>}, {pipeline_mode = #tpu.pipeline_mode<synchronous>, transform_indices = @transform_3, window_bounds = array<i64: 1, 128>}, {transform_indices = @transform_4, window_bounds = array<i64: 1>}, {pipeline_mode = #tpu.pipeline_mode<synchronous>, transform_indices = @transform_5, window_bounds = array<i64: 128, 128>}, {pipeline_mode = #tpu.pipeline_mode<synchronous>, transform_indices = @transform_6, window_bounds = array<i64: 384, 128>}, {pipeline_mode = #tpu.pipeline_mode<synchronous>, transform_indices = @transform_7, window_bounds = array<i64: 128, 128>}, {transform_indices = @transform_8, window_bounds = array<i64: 1, 16, 128>}, {transform_indices = @transform_9, window_bounds = array<i64: 1, 2, 128>}]} {
    %c0 = arith.constant 0 : index
    %c0_0 = arith.constant 0 : index
    %c0_1 = arith.constant 0 : index
    %0 = vector.load %arg2[%c0, %c0_0, %c0_1] : memref<2x2x128xf32, #tpu.memory_space<vmem>>, vector<2x2x128xf32>
    %cst = arith.constant dense<0.000000e+00> : vector<2x128xf32>
    %1 = vector.multi_reduction <add>, %0, %cst [0] : vector<2x2x128xf32> to vector<2x128xf32>
    %2 = vector.extract_strided_slice %1 {offsets = [0, 0], sizes = [1, 128], strides = [1, 1]} : vector<2x128xf32> to vector<1x128xf32>
    %cst_2 = arith.constant 0.001953125 : f32
    %3 = vector.broadcast %cst_2 : f32 to vector<1x128xf32>
    %4 = arith.mulf %2, %3 : vector<1x128xf32>
    %5 = vector.extract_strided_slice %1 {offsets = [1, 0], sizes = [1, 128], strides = [1, 1]} : vector<2x128xf32> to vector<1x128xf32>
    %cst_3 = arith.constant 0.001953125 : f32
    %6 = vector.broadcast %cst_3 : f32 to vector<1x128xf32>
    %7 = arith.mulf %5, %6 : vector<1x128xf32>
    %8 = arith.mulf %4, %4 : vector<1x128xf32>
    %9 = arith.subf %7, %8 : vector<1x128xf32>
    %c0_4 = arith.constant 0 : index
    %c0_5 = arith.constant 0 : index
    %10 = vector.load %arg3[%c0_4, %c0_5] : memref<1x128xf32, #tpu.memory_space<vmem>>, vector<1x128xf32>
    %cst_6 = arith.constant 9.99999974E-6 : f32
    %11 = vector.broadcast %cst_6 : f32 to vector<1x128xf32>
    %12 = arith.addf %9, %11 : vector<1x128xf32>
    %13 = math.rsqrt %12 : vector<1x128xf32>
    %14 = arith.mulf %10, %13 : vector<1x128xf32>
    %c0_7 = arith.constant 0 : index
    %c0_8 = arith.constant 0 : index
    %15 = vector.load %arg4[%c0_7, %c0_8] : memref<1x128xf32, #tpu.memory_space<vmem>>, vector<1x128xf32>
    %16 = arith.mulf %4, %14 : vector<1x128xf32>
    %17 = arith.subf %15, %16 : vector<1x128xf32>
    %c0_9 = arith.constant 0 : index
    %c0_10 = arith.constant 0 : index
    %18 = vector.load %arg6[%c0_9, %c0_10] : memref<128x128xf32, #tpu.memory_space<vmem>>, vector<128x128xf32>
    %cst_11 = arith.constant dense<0.000000e+00> : vector<1x128xf32>
    %19 = tpu.matmul %14, %18, %cst_11 {dimension_numbers = #tpu.dot_dimension_numbers<[1], [0], [0], [1], [0, 0, 1, 1], [], []>} : vector<1x128xf32>, vector<128x128xf32>, vector<1x128xf32> -> vector<1x128xf32>
    %c0_12 = arith.constant 0 : index
    %c0_13 = arith.constant 0 : index
    %20 = vector.load %arg6[%c0_12, %c0_13] : memref<128x128xf32, #tpu.memory_space<vmem>>, vector<128x128xf32>
    %cst_14 = arith.constant dense<0.000000e+00> : vector<1x128xf32>
    %21 = tpu.matmul %17, %20, %cst_14 {dimension_numbers = #tpu.dot_dimension_numbers<[1], [0], [0], [1], [0, 0, 1, 1], [], []>} : vector<1x128xf32>, vector<128x128xf32>, vector<1x128xf32> -> vector<1x128xf32>
    %c0_15 = arith.constant 0 : index
    %c0_16 = arith.constant 0 : index
    %c0_17 = arith.constant 0 : index
    %22 = vector.load %arg1[%c0_15, %c0_16, %c0_17] : memref<1x16x128xf32, #tpu.memory_space<vmem>>, vector<1x16x128xf32>
    %23 = vector.shape_cast %22 : vector<1x16x128xf32> to vector<16x128xf32>
    %24 = vector.broadcast %19 : vector<1x128xf32> to vector<16x128xf32>
    %25 = arith.mulf %23, %24 : vector<16x128xf32>
    %26 = vector.broadcast %21 : vector<1x128xf32> to vector<16x128xf32>
    %27 = arith.addf %25, %26 : vector<16x128xf32>
    %c0_18 = arith.constant 0 : index
    %28 = memref.load %arg5[%c0_18] : memref<1xf32, #tpu.memory_space<smem>>
    %cst_19 = arith.constant 0.000000e+00 : f32
    %29 = vector.broadcast %cst_19 : f32 to vector<16x128xf32>
    %30 = arith.cmpf oge, %27, %29 : vector<16x128xf32>
    %31 = vector.broadcast %28 : f32 to vector<16x128xf32>
    %32 = arith.mulf %31, %27 : vector<16x128xf32>
    %33 = arith.select %30, %27, %32 : vector<16x128xi1>, vector<16x128xf32>
    %cst_20 = arith.constant 0.000000e+00 : f32
    %34 = vector.broadcast %cst_20 : f32 to vector<1x128xf32>
    %35 = tpu.concatenate %34, %33, %34 in 0 : vector<1x128xf32>, vector<16x128xf32>, vector<1x128xf32> -> vector<18x128xf32>
    %36 = vector.extract_strided_slice %35 {offsets = [0, 0], sizes = [16, 128], strides = [1, 1]} : vector<18x128xf32> to vector<16x128xf32>
    %37 = vector.extract_strided_slice %35 {offsets = [1, 0], sizes = [16, 128], strides = [1, 1]} : vector<18x128xf32> to vector<16x128xf32>
    %38 = vector.extract_strided_slice %35 {offsets = [2, 0], sizes = [16, 128], strides = [1, 1]} : vector<18x128xf32> to vector<16x128xf32>
    %39 = tpu.concatenate %36, %37, %38 in 1 : vector<16x128xf32>, vector<16x128xf32>, vector<16x128xf32> -> vector<16x384xf32>
    %c0_21 = arith.constant 0 : index
    %c0_22 = arith.constant 0 : index
    %40 = vector.load %arg7[%c0_21, %c0_22] : memref<384x128xf32, #tpu.memory_space<vmem>>, vector<384x128xf32>
    %cst_23 = arith.constant dense<0.000000e+00> : vector<16x128xf32>
    %41 = tpu.matmul %39, %40, %cst_23 {dimension_numbers = #tpu.dot_dimension_numbers<[1], [0], [0], [1], [0, 0, 1, 1], [], []>} : vector<16x384xf32>, vector<384x128xf32>, vector<16x128xf32> -> vector<16x128xf32>
    %c0_24 = arith.constant 0 : index
    %c0_25 = arith.constant 0 : index
    %c0_26 = arith.constant 0 : index
    %42 = vector.load %arg9[%c0_24, %c0_25, %c0_26] : memref<1x16x128xf32, #tpu.memory_space<vmem>>, vector<1x16x128xf32>
    %43 = vector.shape_cast %42 : vector<1x16x128xf32> to vector<16x128xf32>
    %44 = vector.shape_cast %41 : vector<16x128xf32> to vector<1x16x128xf32>
    tpu.vector_store %arg9[%c0_24, %c0_25, %c0_26], %44 {strides = array<i32>} : memref<1x16x128xf32, #tpu.memory_space<vmem>>, vector<1x16x128xf32>,
    %cst_27 = arith.constant dense<0.000000e+00> : vector<128xf32>
    %45 = vector.multi_reduction <add>, %41, %cst_27 [0] : vector<16x128xf32> to vector<128xf32>
    %46 = vector.shape_cast %45 : vector<128xf32> to vector<1x128xf32>
    %47 = arith.mulf %41, %41 : vector<16x128xf32>
    %cst_28 = arith.constant dense<0.000000e+00> : vector<128xf32>
    %48 = vector.multi_reduction <add>, %47, %cst_28 [0] : vector<16x128xf32> to vector<128xf32>
    %49 = vector.shape_cast %48 : vector<128xf32> to vector<1x128xf32>
    %c0_29 = arith.constant 0 : index
    %c0_30 = arith.constant 0 : index
    %50 = vector.load %arg8[%c0_29, %c0_30] : memref<128x128xf32, #tpu.memory_space<vmem>>, vector<128x128xf32>
    %cst_31 = arith.constant dense<0.000000e+00> : vector<1x128xf32>
    %51 = tpu.matmul %46, %50, %cst_31 {dimension_numbers = #tpu.dot_dimension_numbers<[1], [0], [0], [1], [0, 0, 1, 1], [], []>} : vector<1x128xf32>, vector<128x128xf32>, vector<1x128xf32> -> vector<1x128xf32>
    %c0_32 = arith.constant 0 : index
    %c0_33 = arith.constant 0 : index
    %52 = vector.load %arg8[%c0_32, %c0_33] : memref<128x128xf32, #tpu.memory_space<vmem>>, vector<128x128xf32>
    %cst_34 = arith.constant dense<0.000000e+00> : vector<1x128xf32>
    %53 = tpu.matmul %49, %52, %cst_34 {dimension_numbers = #tpu.dot_dimension_numbers<[1], [0], [0], [1], [0, 0, 1, 1], [], []>} : vector<1x128xf32>, vector<128x128xf32>, vector<1x128xf32> -> vector<1x128xf32>
    %54 = tpu.concatenate %51, %53 in 0 : vector<1x128xf32>, vector<1x128xf32> -> vector<2x128xf32>
    %c0_35 = arith.constant 0 : index
    %c0_36 = arith.constant 0 : index
    %c0_37 = arith.constant 0 : index
    %55 = vector.load %arg10[%c0_35, %c0_36, %c0_37] : memref<1x2x128xf32, #tpu.memory_space<vmem>>, vector<1x2x128xf32>
    %56 = vector.shape_cast %55 : vector<1x2x128xf32> to vector<2x128xf32>
    %57 = vector.shape_cast %54 : vector<2x128xf32> to vector<1x2x128xf32>
    tpu.vector_store %arg10[%c0_35, %c0_36, %c0_37], %57 {strides = array<i32>} : memref<1x2x128xf32, #tpu.memory_space<vmem>>, vector<1x2x128xf32>,
    return
  }
  func.func @transform_0(%arg0: i32) -> (i32, i32, i32) {
    %c0_i32 = arith.constant 0 : i32
    %c0_i32_0 = arith.constant 0 : i32
    %c0_i32_1 = arith.constant 0 : i32
    return %arg0, %c0_i32, %c0_i32_0 : i32, i32, i32
  }
  func.func @transform_1(%arg0: i32) -> (i32, i32, i32) {
    %c0_i32 = arith.constant 0 : i32
    %c0_i32_0 = arith.constant 0 : i32
    %c0_i32_1 = arith.constant 0 : i32
    %c0_i32_2 = arith.constant 0 : i32
    return %c0_i32, %c0_i32_0, %c0_i32_1 : i32, i32, i32
  }
  func.func @transform_2(%arg0: i32) -> (i32, i32) {
    %c0_i32 = arith.constant 0 : i32
    %c0_i32_0 = arith.constant 0 : i32
    %c0_i32_1 = arith.constant 0 : i32
    return %c0_i32, %c0_i32_0 : i32, i32
  }
  func.func @transform_3(%arg0: i32) -> (i32, i32) {
    %c0_i32 = arith.constant 0 : i32
    %c0_i32_0 = arith.constant 0 : i32
    %c0_i32_1 = arith.constant 0 : i32
    return %c0_i32, %c0_i32_0 : i32, i32
  }
  func.func @transform_4(%arg0: i32) -> i32 {
    %c0_i32 = arith.constant 0 : i32
    %c0_i32_0 = arith.constant 0 : i32
    return %c0_i32 : i32
  }
  func.func @transform_5(%arg0: i32) -> (i32, i32) {
    %c0_i32 = arith.constant 0 : i32
    %c0_i32_0 = arith.constant 0 : i32
    %c0_i32_1 = arith.constant 0 : i32
    return %c0_i32, %c0_i32_0 : i32, i32
  }
  func.func @transform_6(%arg0: i32) -> (i32, i32) {
    %c0_i32 = arith.constant 0 : i32
    %c0_i32_0 = arith.constant 0 : i32
    %c0_i32_1 = arith.constant 0 : i32
    return %c0_i32, %c0_i32_0 : i32, i32
  }
  func.func @transform_7(%arg0: i32) -> (i32, i32) {
    %c0_i32 = arith.constant 0 : i32
    %c0_i32_0 = arith.constant 0 : i32
    %c0_i32_1 = arith.constant 0 : i32
    return %c0_i32, %c0_i32_0 : i32, i32
  }
  func.func @transform_8(%arg0: i32) -> (i32, i32, i32) {
    %c0_i32 = arith.constant 0 : i32
    %c0_i32_0 = arith.constant 0 : i32
    %c0_i32_1 = arith.constant 0 : i32
    return %arg0, %c0_i32, %c0_i32_0 : i32, i32, i32
  }
  func.func @transform_9(%arg0: i32) -> (i32, i32, i32) {
    %c0_i32 = arith.constant 0 : i32
    %c0_i32_0 = arith.constant 0 : i32
    %c0_i32_1 = arith.constant 0 : i32
    return %arg0, %c0_i32, %c0_i32_0 : i32, i32, i32
  }
}

module attributes {stable_mosaic.version = 11 : i64} {
  func.func @_bn_residual_kernel(%arg0: i32, %arg1: memref<1x16x128xf32, #tpu.memory_space<vmem>>, %arg2: memref<2x2x128xf32, #tpu.memory_space<vmem>>, %arg3: memref<1x128xf32, #tpu.memory_space<vmem>>, %arg4: memref<1x128xf32, #tpu.memory_space<vmem>>, %arg5: memref<128x128xf32, #tpu.memory_space<vmem>>, %arg6: memref<1x16x128xf32, #tpu.memory_space<vmem>>, %arg7: memref<1x16x128xf32, #tpu.memory_space<vmem>>) attributes {dimension_semantics = [#tpu.dimension_semantics<parallel>], iteration_bounds = array<i64: 2>, scalar_prefetch = 0 : i64, scratch_operands = 0 : i64, tpu.core_type = #tpu.core_type<tc>, window_params = [{transform_indices = @transform_0, window_bounds = array<i64: 1, 16, 128>}, {pipeline_mode = #tpu.pipeline_mode<synchronous>, transform_indices = @transform_1, window_bounds = array<i64: 2, 2, 128>}, {pipeline_mode = #tpu.pipeline_mode<synchronous>, transform_indices = @transform_2, window_bounds = array<i64: 1, 128>}, {pipeline_mode = #tpu.pipeline_mode<synchronous>, transform_indices = @transform_3, window_bounds = array<i64: 1, 128>}, {pipeline_mode = #tpu.pipeline_mode<synchronous>, transform_indices = @transform_4, window_bounds = array<i64: 128, 128>}, {transform_indices = @transform_5, window_bounds = array<i64: 1, 16, 128>}, {transform_indices = @transform_6, window_bounds = array<i64: 1, 16, 128>}]} {
    %c0 = arith.constant 0 : index
    %c0_0 = arith.constant 0 : index
    %c0_1 = arith.constant 0 : index
    %0 = vector.load %arg2[%c0, %c0_0, %c0_1] : memref<2x2x128xf32, #tpu.memory_space<vmem>>, vector<2x2x128xf32>
    %cst = arith.constant dense<0.000000e+00> : vector<2x128xf32>
    %1 = vector.multi_reduction <add>, %0, %cst [0] : vector<2x2x128xf32> to vector<2x128xf32>
    %2 = vector.extract_strided_slice %1 {offsets = [0, 0], sizes = [1, 128], strides = [1, 1]} : vector<2x128xf32> to vector<1x128xf32>
    %cst_2 = arith.constant 0.001953125 : f32
    %3 = vector.broadcast %cst_2 : f32 to vector<1x128xf32>
    %4 = arith.mulf %2, %3 : vector<1x128xf32>
    %5 = vector.extract_strided_slice %1 {offsets = [1, 0], sizes = [1, 128], strides = [1, 1]} : vector<2x128xf32> to vector<1x128xf32>
    %cst_3 = arith.constant 0.001953125 : f32
    %6 = vector.broadcast %cst_3 : f32 to vector<1x128xf32>
    %7 = arith.mulf %5, %6 : vector<1x128xf32>
    %8 = arith.mulf %4, %4 : vector<1x128xf32>
    %9 = arith.subf %7, %8 : vector<1x128xf32>
    %c0_4 = arith.constant 0 : index
    %c0_5 = arith.constant 0 : index
    %10 = vector.load %arg3[%c0_4, %c0_5] : memref<1x128xf32, #tpu.memory_space<vmem>>, vector<1x128xf32>
    %cst_6 = arith.constant 9.99999974E-6 : f32
    %11 = vector.broadcast %cst_6 : f32 to vector<1x128xf32>
    %12 = arith.addf %9, %11 : vector<1x128xf32>
    %13 = math.rsqrt %12 : vector<1x128xf32>
    %14 = arith.mulf %10, %13 : vector<1x128xf32>
    %c0_7 = arith.constant 0 : index
    %c0_8 = arith.constant 0 : index
    %15 = vector.load %arg4[%c0_7, %c0_8] : memref<1x128xf32, #tpu.memory_space<vmem>>, vector<1x128xf32>
    %16 = arith.mulf %4, %14 : vector<1x128xf32>
    %17 = arith.subf %15, %16 : vector<1x128xf32>
    %c0_9 = arith.constant 0 : index
    %c0_10 = arith.constant 0 : index
    %18 = vector.load %arg5[%c0_9, %c0_10] : memref<128x128xf32, #tpu.memory_space<vmem>>, vector<128x128xf32>
    %cst_11 = arith.constant dense<0.000000e+00> : vector<1x128xf32>
    %19 = tpu.matmul %14, %18, %cst_11 {dimension_numbers = #tpu.dot_dimension_numbers<[1], [0], [0], [1], [0, 0, 1, 1], [], []>} : vector<1x128xf32>, vector<128x128xf32>, vector<1x128xf32> -> vector<1x128xf32>
    %c0_12 = arith.constant 0 : index
    %c0_13 = arith.constant 0 : index
    %20 = vector.load %arg5[%c0_12, %c0_13] : memref<128x128xf32, #tpu.memory_space<vmem>>, vector<128x128xf32>
    %cst_14 = arith.constant dense<0.000000e+00> : vector<1x128xf32>
    %21 = tpu.matmul %17, %20, %cst_14 {dimension_numbers = #tpu.dot_dimension_numbers<[1], [0], [0], [1], [0, 0, 1, 1], [], []>} : vector<1x128xf32>, vector<128x128xf32>, vector<1x128xf32> -> vector<1x128xf32>
    %c0_15 = arith.constant 0 : index
    %c0_16 = arith.constant 0 : index
    %c0_17 = arith.constant 0 : index
    %22 = vector.load %arg1[%c0_15, %c0_16, %c0_17] : memref<1x16x128xf32, #tpu.memory_space<vmem>>, vector<1x16x128xf32>
    %23 = vector.shape_cast %22 : vector<1x16x128xf32> to vector<16x128xf32>
    %24 = vector.broadcast %19 : vector<1x128xf32> to vector<16x128xf32>
    %25 = arith.mulf %23, %24 : vector<16x128xf32>
    %26 = vector.broadcast %21 : vector<1x128xf32> to vector<16x128xf32>
    %27 = arith.addf %25, %26 : vector<16x128xf32>
    %c0_18 = arith.constant 0 : index
    %c0_19 = arith.constant 0 : index
    %c0_20 = arith.constant 0 : index
    %28 = vector.load %arg6[%c0_18, %c0_19, %c0_20] : memref<1x16x128xf32, #tpu.memory_space<vmem>>, vector<1x16x128xf32>
    %29 = vector.shape_cast %28 : vector<1x16x128xf32> to vector<16x128xf32>
    %30 = arith.addf %27, %29 : vector<16x128xf32>
    %c0_21 = arith.constant 0 : index
    %c0_22 = arith.constant 0 : index
    %c0_23 = arith.constant 0 : index
    %31 = vector.load %arg7[%c0_21, %c0_22, %c0_23] : memref<1x16x128xf32, #tpu.memory_space<vmem>>, vector<1x16x128xf32>
    %32 = vector.shape_cast %31 : vector<1x16x128xf32> to vector<16x128xf32>
    %33 = vector.shape_cast %30 : vector<16x128xf32> to vector<1x16x128xf32>
    tpu.vector_store %arg7[%c0_21, %c0_22, %c0_23], %33 {strides = array<i32>} : memref<1x16x128xf32, #tpu.memory_space<vmem>>, vector<1x16x128xf32>,
    return
  }
  func.func @transform_0(%arg0: i32) -> (i32, i32, i32) {
    %c0_i32 = arith.constant 0 : i32
    %c0_i32_0 = arith.constant 0 : i32
    %c0_i32_1 = arith.constant 0 : i32
    return %arg0, %c0_i32, %c0_i32_0 : i32, i32, i32
  }
  func.func @transform_1(%arg0: i32) -> (i32, i32, i32) {
    %c0_i32 = arith.constant 0 : i32
    %c0_i32_0 = arith.constant 0 : i32
    %c0_i32_1 = arith.constant 0 : i32
    %c0_i32_2 = arith.constant 0 : i32
    return %c0_i32, %c0_i32_0, %c0_i32_1 : i32, i32, i32
  }
  func.func @transform_2(%arg0: i32) -> (i32, i32) {
    %c0_i32 = arith.constant 0 : i32
    %c0_i32_0 = arith.constant 0 : i32
    %c0_i32_1 = arith.constant 0 : i32
    return %c0_i32, %c0_i32_0 : i32, i32
  }
  func.func @transform_3(%arg0: i32) -> (i32, i32) {
    %c0_i32 = arith.constant 0 : i32
    %c0_i32_0 = arith.constant 0 : i32
    %c0_i32_1 = arith.constant 0 : i32
    return %c0_i32, %c0_i32_0 : i32, i32
  }
  func.func @transform_4(%arg0: i32) -> (i32, i32) {
    %c0_i32 = arith.constant 0 : i32
    %c0_i32_0 = arith.constant 0 : i32
    %c0_i32_1 = arith.constant 0 : i32
    return %c0_i32, %c0_i32_0 : i32, i32
  }
  func.func @transform_5(%arg0: i32) -> (i32, i32, i32) {
    %c0_i32 = arith.constant 0 : i32
    %c0_i32_0 = arith.constant 0 : i32
    %c0_i32_1 = arith.constant 0 : i32
    return %arg0, %c0_i32, %c0_i32_0 : i32, i32, i32
  }
  func.func @transform_6(%arg0: i32) -> (i32, i32, i32) {
    %c0_i32 = arith.constant 0 : i32
    %c0_i32_0 = arith.constant 0 : i32
    %c0_i32_1 = arith.constant 0 : i32
    return %arg0, %c0_i32, %c0_i32_0 : i32, i32, i32
  }
}

</mosaic_0001>

<bundles_post_ra>
// kernel: eq.8
= control target key start
LH: loop header
LB: loop body
LE: loop exit
PB: predicated region body
PF: predicated region fallthrough
CT: control target
= control target key end

     0   :  { %s131_s10 = smov 120   ;;  %s132_s11 = smov 104   ;;  %vm3_vm0 = vcmask 64512   ;;  %vm9_vm1 = vcmask 1048512   ;;  %vm15_vm2 = vcmask 982912   ;;  %vm21_vm3 = vcmask 917312   ;;  %s207_s0 = inlined_call_operand.vmem [shape: s32[16,8], index: 0, kind: input, shape index: {}]   ;;  %s208_s1 = inlined_call_operand.vmem [shape: s32[128], index: 1, kind: output, shape index: {}]  }
   0x1   :  { %v101_v0 = vld [vmem:[%s207_s0 + $0xf] sm:$0x1]   ;;  %v103_v1 = vld [vmem:[%s207_s0 + $0xd] sm:$0x1]   ;;  %v105_v2 = vld [vmem:[%s207_s0 + $0xb] sm:$0x1]  }
   0x2   :  { %7 = vrot.lane.b32.xlu0 %v101_v0, %s131_s10  ;;  %19 = vrot.lane.b32.xlu1 %v103_v1, %s132_s11  ;;  %s133_s14 = smov 88   ;;  %v102_v3 = vld [vmem:[%s207_s0 + $0xe] sm:$0x1]   ;;  %v104_v4 = vld [vmem:[%s207_s0 + $0xc] sm:$0x1]   ;;  %s134_s19 = smov 112  }
   0x3   :  { %31 = vrot.lane.b32.xlu2 %v105_v2, %s133_s14  ;;  %s135_s20 = smov 96   ;;  %v106_v5 = vld [vmem:[%s207_s0 + $0xa] sm:$0x1]   ;;  %s136_s23 = smov 80   ;;  %v107_v6 = vld [vmem:[%s207_s0 + $0x9] sm:$0x1]  }
   0x4   :  { %v108_v7 = vld [vmem:[%s207_s0 + $0x8] sm:$0x1]   ;;  %s137_s28 = smov 72   ;;  %s138_s29 = smov 64   ;;  %v109_v8 = vld [vmem:[%s207_s0 + $0x7] sm:$0x1]  }
   0x5   :  { %s139_s3 = smov 56   ;;  %v110_v9 = vld [vmem:[%s207_s0 + $0x6] sm:$0x1]   ;;  %v111_v10 = vld [vmem:[%s207_s0 + $0x5] sm:$0x1]   ;;  %s140_s8 = smov 48  }
   0x6   :  { %s141_s9 = smov 40   ;;  %v112_v11 = vld [vmem:[%s207_s0 + $0x4] sm:$0x1]   ;;  %s142_s12 = smov 32   ;;  %v113_v12 = vld [vmem:[%s207_s0 + $0x3] sm:$0x1]  }
   0x7   :  { %v114_v13 = vld [vmem:[%s207_s0 + $0x2] sm:$0x1]   ;;  %s143_s17 = smov 24   ;;  %s144_s18 = smov 16   ;;  %v115_v14 = vld [vmem:[%s207_s0 + $0x1] sm:$0x1]  }
   0x8   :  { %s145_s21 = smov 8   ;;  %v2_v15 = vld [vmem:[%s207_s0] sm:$0x1]   ;;  %vm27_vm4 = vcmask 851712   ;;  %vm33_vm5 = vcmask 786112   ;;  %vm39_vm6 = vcmask 720512  }
   0x9   :  { %4 = vst.msk [vmem:[#allocation0] sm:$0x1] %vm3_vm0, %v2_v15   ;;  %vm45_vm7 = vcmask 654912   ;;  %vm51_vm8 = vcmask 589312   ;;  %vm57_vm9 = vcmask 523712   ;;  %vm63_vm10 = vcmask 458112  }
   0xa   :  { %13 = vrot.lane.b32.xlu0 %v102_v3, %s134_s19  ;;  %25 = vrot.lane.b32.xlu1 %v104_v4, %s135_s20  ;;  %vm69_vm11 = vcmask 392512   ;;  %vm75_vm12 = vcmask 326912   ;;  %vm81_vm13 = vcmask 261312   ;;  %vm87_vm14 = vcmask 195712  }
   0xb   :  { %37 = vrot.lane.b32.xlu2 %v106_v5, %s136_s23  ;;  %vm93_vm15 = vcmask 130112  }
  0x12   :  { %43 = vrot.lane.b32.xlu0 %v107_v6, %s137_s28  ;;  %49 = vrot.lane.b32.xlu1 %v108_v7, %s138_s29 }
  0x13   :  { %55 = vrot.lane.b32.xlu2 %v109_v8, %s139_s3 }
  0x1a   :  { %61 = vrot.lane.b32.xlu0 %v110_v9, %s140_s8  ;;  %67 = vrot.lane.b32.xlu1 %v111_v10, %s141_s9 }
  0x1b   :  { %73 = vrot.lane.b32.xlu2 %v112_v11, %s142_s12 }
  0x22   :  { %79 = vrot.lane.b32.xlu0 %v113_v12, %s143_s17  ;;  %85 = vrot.lane.b32.xlu1 %v114_v13, %s144_s18 }
  0x23   :  { %91 = vrot.lane.b32.xlu2 %v115_v14, %s145_s21 }
  0x5d   :  { %v32_v16 = vpop.permute.xlu2 %31  }
  0x65   :  { %v38_v17 = vpop.permute.xlu2 %37  }
  0x6d   :  { %v56_v18 = vpop.permute.xlu2 %55  }
  0x74   :  { %v8_v19 = vpop.permute.xlu0 %7   ;;  %v20_v20 = vpop.permute.xlu1 %19  }
  0x75   :  { %10 = vst.msk [vmem:[#allocation0] sm:$0x1] %vm9_vm1, %v8_v19   ;;  %v74_v21 = vpop.permute.xlu2 %73  }
  0x7c   :  { %v14_v22 = vpop.permute.xlu0 %13   ;;  %v26_v23 = vpop.permute.xlu1 %25  }
  0x7d   :  { %16 = vst.msk [vmem:[#allocation0] sm:$0x1] %vm15_vm2, %v14_v22   ;;  %v92_v24 = vpop.permute.xlu2 %91  }
  0x7e   :  { %22 = vst.msk [vmem:[#allocation0] sm:$0x1] %vm21_vm3, %v20_v20  }
  0x7f   :  { %28 = vst.msk [vmem:[#allocation0] sm:$0x1] %vm27_vm4, %v26_v23  }
  0x80   :  { %34 = vst.msk [vmem:[#allocation0] sm:$0x1] %vm33_vm5, %v32_v16  }
  0x81   :  { %40 = vst.msk [vmem:[#allocation0] sm:$0x1] %vm39_vm6, %v38_v17  }
  0x84   :  { %v44_v25 = vpop.permute.xlu0 %43   ;;  %v50_v26 = vpop.permute.xlu1 %49  }
  0x85   :  { %46 = vst.msk [vmem:[#allocation0] sm:$0x1] %vm45_vm7, %v44_v25  }
  0x86   :  { %52 = vst.msk [vmem:[#allocation0] sm:$0x1] %vm51_vm8, %v50_v26  }
  0x87   :  { %58 = vst.msk [vmem:[#allocation0] sm:$0x1] %vm57_vm9, %v56_v18  }
  0x8c   :  { %v62_v27 = vpop.permute.xlu0 %61   ;;  %v68_v28 = vpop.permute.xlu1 %67  }
  0x8d   :  { %64 = vst.msk [vmem:[#allocation0] sm:$0x1] %vm63_vm10, %v62_v27  }
  0x8e   :  { %70 = vst.msk [vmem:[#allocation0] sm:$0x1] %vm69_vm11, %v68_v28  }
  0x8f   :  { %76 = vst.msk [vmem:[#allocation0] sm:$0x1] %vm75_vm12, %v74_v21  }
  0x94   :  { %v80_v29 = vpop.permute.xlu0 %79   ;;  %v86_v30 = vpop.permute.xlu1 %85  }
  0x95   :  { %82 = vst.msk [vmem:[#allocation0] sm:$0x1] %vm81_vm13, %v80_v29  }
  0x96   :  { %88 = vst.msk [vmem:[#allocation0] sm:$0x1] %vm87_vm14, %v86_v30  }
  0x97   :  { %94 = vst.msk [vmem:[#allocation0] sm:$0x1] %vm93_vm15, %v92_v24  }
  0x9e   :  { %v97_v31 = vld [vmem:[#allocation0] sm:$0x1] }
  0x9f   :  { %100 = vst [vmem:[%s208_s1] sm:$0x1] %v97_v31 }

// kernel: residual_block_forward.3
= control target key start
LH: loop header
LB: loop body
LE: loop exit
PB: predicated region body
PF: predicated region fallthrough
CT: control target
= control target key end

     0   :  { %s568_s15 = smov 0   ;;  %s798_s0 = inlined_call_operand.vmem [shape: f32[2,18,128], index: 0, kind: input, shape index: {}]   ;;  %s799_s1 = inlined_call_operand.vmem [shape: f32[384,128], index: 1, kind: input, shape index: {}]   ;;  %s800_s2 = inlined_call_operand.vmem [shape: f32[128,128], index: 2, kind: input, shape index: {}]   ;;  %s801_s3 = inlined_call_operand.vmem [shape: f32[2,16,128], index: 3, kind: output, shape index: {0}]   ;;  %s802_s4 = inlined_call_operand.vmem [shape: f32[2,2,128], index: 4, kind: output, shape index: {1}]  }
   0x1 LB: > { %s514_s16 = sadd.s32 4294967295, %s541_s15   ;;  %p518_p0 = scmp.ge.s32.totalorder %s541_s15, 1  ;;  %s541_s15 = sphi %s568_s15, %s15_s15  }
   0x2   : > { %p165_p1 = scmp.lt.s32.totalorder %s541_s15, 3 }
   0x4   : > { %p166_p2 = pnand %p518_p0, %p165_p1 }
   0x5   : > { %p195_p3 = scmp.lt.s32.totalorder (!%p166_p2), %s514_s16, 1 }
   0x6   : > { %169 = sbr.rel (%p166_p2) target bundleno = 333 (0x14d), region = 32 }
   0xb   : > { %v278_v0 = vld [vmem:[%s799_s1 + $0x178] sm:$0xff]  ;;  %v277_v1 = vld [vmem:[%s799_s1 + $0x170] sm:$0xff]  ;;  %v276_v5 = vld [vmem:[%s799_s1 + $0x168] sm:$0xff]  ;;  %s804_s16 = smov (!%p195_p3, %s514_s16), 1  ;;  %vm223_vm0 = vcmask 1045504   ;;  %vm215_vm1 = vcmask 1046528  }
   0xc   : > { %v246_v2 = vld [vmem:[%s799_s1 + $0x78] sm:$0xff]  ;;  %325 = vmatpush.msra.mxu2 %v278_v0  ;;  %v245_v4 = vld [vmem:[%s799_s1 + $0x70] sm:$0xff]  ;;  %v244_v7 = vld [vmem:[%s799_s1 + $0x68] sm:$0xff]  ;;  %s526_s23 = smul.u32 24, %s804_s16  ;;  %s525_s29 = sshll.u32 %s804_s16, 4  ;;  %vm425_vm2 = vcmask 1040384  }
   0xd   : > { %279 = vmatpush.msra.mxu0 %v246_v2  ;;  %v262_v3 = vld [vmem:[%s799_s1 + $0xf8] sm:$0xff]  ;;  %v261_v6 = vld [vmem:[%s799_s1 + $0xf0] sm:$0xff]  ;;  %v260_v8 = vld [vmem:[%s799_s1 + $0xe8] sm:$0xff]  ;;  %s204_s6 = scalar_lea.vmem %s801_s3, %s525_s29  ;;  %s522_s7 = sshll.u32 %s804_s16, 1 }
   0xe   : > { %302 = vmatpush.msra.mxu1 %v262_v3  ;;  %326 = vmatpush.msra.mxu2 %v277_v1  ;;  %v275_v9 = vld [vmem:[%s799_s1 + $0x160] sm:$0xff]  ;;  %v274_v12 = vld [vmem:[%s799_s1 + $0x158] sm:$0xff]  ;;  %v273_v15 = vld [vmem:[%s799_s1 + $0x150] sm:$0xff]  ;;  %s691_s18 = scalar_lea.vmem %s798_s0, %s526_s23  ;;  %s208_s10 = scalar_lea.vmem %s802_s4, %s522_s7 }
   0xf   : > { %280 = vmatpush.msra.mxu0 %v245_v4  ;;  %v243_v10 = vld [vmem:[%s799_s1 + $0x60] sm:$0xff]  ;;  %v242_v13 = vld [vmem:[%s799_s1 + $0x58] sm:$0xff]  ;;  %v241_v16 = vld [vmem:[%s799_s1 + $0x50] sm:$0xff] }
  0x10   : > { %303 = vmatpush.msra.mxu1 %v261_v6  ;;  %327 = vmatpush.msra.mxu2 %v276_v5  ;;  %v259_v11 = vld [vmem:[%s799_s1 + $0xe0] sm:$0xff]  ;;  %v258_v14 = vld [vmem:[%s799_s1 + $0xd8] sm:$0xff]  ;;  %v257_v17 = vld [vmem:[%s799_s1 + $0xd0] sm:$0xff] }
  0x11   : > { %281 = vmatpush.msra.mxu0 %v244_v7  ;;  %v272_v18 = vld [vmem:[%s799_s1 + $0x148] sm:$0xff]  ;;  %v271_v21 = vld [vmem:[%s799_s1 + $0x140] sm:$0xff]  ;;  %v270_v24 = vld [vmem:[%s799_s1 + $0x138] sm:$0xff] }
  0x12   : > { %304 = vmatpush.msra.mxu1 %v260_v8  ;;  %328 = vmatpush.msra.mxu2 %v275_v9  ;;  %v240_v19 = vld [vmem:[%s799_s1 + $0x48] sm:$0xff]  ;;  %v239_v22 = vld [vmem:[%s799_s1 + $0x40] sm:$0xff]  ;;  %v238_v25 = vld [vmem:[%s799_s1 + $0x38] sm:$0xff] }
  0x13   : > { %282 = vmatpush.msra.mxu0 %v243_v10  ;;  %v256_v20 = vld [vmem:[%s799_s1 + $0xc8] sm:$0xff]  ;;  %v255_v23 = vld [vmem:[%s799_s1 + $0xc0] sm:$0xff]  ;;  %v254_v26 = vld [vmem:[%s799_s1 + $0xb8] sm:$0xff] }
  0x14   : > { %305 = vmatpush.msra.mxu1 %v259_v11  ;;  %329 = vmatpush.msra.mxu2 %v274_v12  ;;  %v269_v27 = vld [vmem:[%s799_s1 + $0x130] sm:$0xff]  ;;  %v381_v30 = vld [vmem:[%s800_s2 + $0x78] sm:$0xff]  ;;  %v268_v32 = vld [vmem:[%s799_s1 + $0x128] sm:$0xff] }
  0x15   : > { %283 = vmatpush.msra.mxu0 %v242_v13  ;;  %v237_v28 = vld [vmem:[%s799_s1 + $0x30] sm:$0xff]  ;;  %v236_v33 = vld [vmem:[%s799_s1 + $0x28] sm:$0xff]  ;;  %382 = vmatpush.msra.mxu3 %v381_v30  ;;  %v267_v35 = vld [vmem:[%s799_s1 + $0x120] sm:$0xff] }
  0x16   : > { %306 = vmatpush.msra.mxu1 %v258_v14  ;;  %330 = vmatpush.msra.mxu2 %v273_v15  ;;  %v253_v29 = vld [vmem:[%s799_s1 + $0xb0] sm:$0xff]  ;;  %v252_v34 = vld [vmem:[%s799_s1 + $0xa8] sm:$0xff]  ;;  %v235_v36 = vld [vmem:[%s799_s1 + $0x20] sm:$0xff] }
  0x17   : > { %284 = vmatpush.msra.mxu0 %v241_v16  ;;  %v380_v31 = vld [vmem:[%s800_s2 + $0x70] sm:$0xff]  ;;  %v266_v37 = vld [vmem:[%s799_s1 + $0x118] sm:$0xff]  ;;  %v251_v38 = vld [vmem:[%s799_s1 + $0xa0] sm:$0xff] }
  0x18   : > { %307 = vmatpush.msra.mxu1 %v257_v17  ;;  %331 = vmatpush.msra.mxu2 %v272_v18  ;;  %v234_v39 = vld [vmem:[%s799_s1 + $0x18] sm:$0xff]  ;;  %v209_v40 = vld [vmem:[%s691_s18] sm:$0xff]  ;;  %v210_v41 = vld [vmem:[%s691_s18 + $0x8] sm:$0xff] }
  0x19   : > { %285 = vmatpush.msra.mxu0 %v240_v19  ;;  %383 = vmatpush.msra.mxu3 %v380_v31  ;;  %v250_v42 = vld [vmem:[%s799_s1 + $0x98] sm:$0xff]  ;;  %v265_v43 = vld [vmem:[%s799_s1 + $0x110] sm:$0xff]  ;;  %v224_v46 = vrot.slane %v209_v40, 2  ;;  %v225_v47 = vrot.slane %v210_v41, 2  ;;  %v264_v48 = vld [vmem:[%s799_s1 + $0x108] sm:$0xff]  ;;  %v216_v50 = vrot.slane %v209_v40, 1 }
  0x1a   : > { %308 = vmatpush.msra.mxu1 %v256_v20  ;;  %332 = vmatpush.msra.mxu2 %v271_v21  ;;  %v233_v44 = vld [vmem:[%s799_s1 + $0x10] sm:$0xff]  ;;  %v232_v49 = vld [vmem:[%s799_s1 + $0x8] sm:$0xff]  ;;  %v217_v51 = vrot.slane %v210_v41, 1  ;;  %v263_v53 = vld [vmem:[%s799_s1 + $0x100] sm:$0xff] }
  0x1b   : > { %286 = vmatpush.msra.mxu0 %v239_v22  ;;  %v249_v45 = vld [vmem:[%s799_s1 + $0x90] sm:$0xff]  ;;  %v248_v52 = vld [vmem:[%s799_s1 + $0x88] sm:$0xff]  ;;  %v231_v54 = vld [vmem:[%s799_s1] sm:$0xff]  ;;  %v226_v55 = vsel %vm223_vm0, %v224_v46, %v225_v47 }
  0x1c   : > { %309 = vmatpush.msra.mxu1 %v255_v23  ;;  %333 = vmatpush.msra.mxu2 %v270_v24  ;;  %v247_v56 = vld [vmem:[%s799_s1 + $0x80] sm:$0xff]  ;;  %v218_v57 = vsel %vm215_vm1, %v216_v50, %v217_v51  ;;  %v211_v58 = vld [vmem:[%s691_s18 + $0x10] sm:$0x3]  ;;  %v379_v63 = vld [vmem:[%s800_s2 + $0x68] sm:$0xff] }
  0x1d   : > { %287 = vmatpush.msra.mxu0 %v238_v25  ;;  %v227_v59 = vrot.slane %v211_v58, 2  ;;  %v219_v60 = vrot.slane %v211_v58, 1  ;;  %384 = vmatpush.msra.mxu3 %v379_v63  ;;  %v378_v0 = vld [vmem:[%s800_s2 + $0x60] sm:$0xff]  ;;  %v377_v1 = vld [vmem:[%s800_s2 + $0x58] sm:$0xff]  ;;  %v376_v2 = vld [vmem:[%s800_s2 + $0x50] sm:$0xff] }
  0x1e   : > { %310 = vmatpush.msra.mxu1 %v254_v26  ;;  %334 = vmatpush.msra.mxu2 %v269_v27  ;;  %v375_v3 = vld [vmem:[%s800_s2 + $0x48] sm:$0xff]  ;;  %v374_v4 = vld [vmem:[%s800_s2 + $0x40] sm:$0xff]  ;;  %v373_v5 = vld [vmem:[%s800_s2 + $0x38] sm:$0xff] }
  0x1f   : > { %288 = vmatpush.msra.mxu0 %v237_v28  ;;  %v228_v61 = vsel %vm223_vm0, %v225_v47, %v227_v59  ;;  %v220_v62 = vsel %vm215_vm1, %v217_v51, %v219_v60  ;;  %385 = vmatpush.msra.mxu3 %v378_v0  ;;  %v372_v6 = vld [vmem:[%s800_s2 + $0x30] sm:$0xff]  ;;  %v371_v7 = vld [vmem:[%s800_s2 + $0x28] sm:$0xff]  ;;  %v370_v8 = vld [vmem:[%s800_s2 + $0x20] sm:$0xff] }
  0x20   : > { %311 = vmatpush.msra.mxu1 %v253_v29  ;;  %335 = vmatpush.msra.mxu2 %v268_v32  ;;  %v369_v9 = vld [vmem:[%s800_s2 + $0x18] sm:$0xff]  ;;  %v368_v10 = vld [vmem:[%s800_s2 + $0x10] sm:$0xff]  ;;  %v367_v11 = vld [vmem:[%s800_s2 + $0x8] sm:$0xff] }
  0x21   : > { %289 = vmatpush.msra.mxu0 %v236_v33  ;;  %386 = vmatpush.msra.mxu3 %v377_v1  ;;  %v366_v12 = vld [vmem:[%s800_s2] sm:$0xff] }
  0x22   : > { %312 = vmatpush.msra.mxu1 %v252_v34  ;;  %336 = vmatpush.msra.mxu2 %v267_v35 }
  0x23   : > { %290 = vmatpush.msra.mxu0 %v235_v36  ;;  %387 = vmatpush.msra.mxu3 %v376_v2 }
  0x24   : > { %313 = vmatpush.msra.mxu1 %v251_v38  ;;  %337 = vmatpush.msra.mxu2 %v266_v37 }
  0x25   : > { %291 = vmatpush.msra.mxu0 %v234_v39  ;;  %388 = vmatpush.msra.mxu3 %v375_v3 }
  0x26   : > { %314 = vmatpush.msra.mxu1 %v250_v42  ;;  %338 = vmatpush.msra.mxu2 %v265_v43 }
  0x27   : > { %292 = vmatpush.msra.mxu0 %v233_v44  ;;  %389 = vmatpush.msra.mxu3 %v374_v4 }
  0x28   : > { %315 = vmatpush.msra.mxu1 %v249_v45  ;;  %339 = vmatpush.msra.mxu2 %v264_v48 }
  0x29   : > { %293 = vmatpush.msra.mxu0 %v232_v49  ;;  %390 = vmatpush.msra.mxu3 %v373_v5 }
  0x2a   : > { %316 = vmatpush.msra.mxu1 %v248_v52  ;;  %340 = vmatpush.msra.mxu2 %v263_v53 }
  0x2b   : > { %294 = vmatpush.msra.mxu0 %v231_v54  ;;  %341 = vmatmul.f32.vlgmr.msra.gmra.mxu2 %v226_v55 }
  0x2c   : > { %317 = vmatpush.msra.mxu1 %v247_v56  ;;  %295 = vmatmul.f32.vlgmr.msra.gmra.mxu0 %v209_v40 }
  0x2d   : > { %318 = vmatmul.f32.vlgmr.msra.gmra.mxu1 %v218_v57  ;;  %402 = vmatpush.msrb.mxu0 %v381_v30 }
  0x2e   : > { %391 = vmatpush.msra.mxu3 %v372_v6 }
  0x2f   : > { %403 = vmatpush.msrb.mxu0 %v380_v31 }
  0x30   : > { %392 = vmatpush.msra.mxu3 %v371_v7 }
  0x31   : > { %404 = vmatpush.msrb.mxu0 %v379_v63 }
  0x32   : > { %393 = vmatpush.msra.mxu3 %v370_v8 }
  0x33   : > { %344 = vmatmul.f32.gmra.mxu2 %v228_v61  ;;  %405 = vmatpush.msrb.mxu0 %v378_v0 }
  0x34   : > { %298 = vmatmul.f32.gmra.mxu0 %v210_v41  ;;  %394 = vmatpush.msra.mxu3 %v369_v9 }
  0x35   : > { %321 = vmatmul.f32.gmra.mxu1 %v220_v62  ;;  %406 = vmatpush.msrb.mxu0 %v377_v1 }
  0x36   : > { %395 = vmatpush.msra.mxu3 %v368_v10 }
  0x37   : > { %407 = vmatpush.msrb.mxu0 %v376_v2 }
  0x38   : > { %396 = vmatpush.msra.mxu3 %v367_v11 }
  0x39   : > { %408 = vmatpush.msrb.mxu0 %v375_v3 }
  0x3a   : > { %397 = vmatpush.msra.mxu3 %v366_v12 }
  0x3b   : > { %409 = vmatpush.msrb.mxu0 %v374_v4 }
  0x3d   : > { %410 = vmatpush.msrb.mxu0 %v373_v5 }
  0x3f   : > { %411 = vmatpush.msrb.mxu0 %v372_v6 }
  0x41   : > { %412 = vmatpush.msrb.mxu0 %v371_v7 }
  0x43   : > { %413 = vmatpush.msrb.mxu0 %v370_v8 }
  0x45   : > { %414 = vmatpush.msrb.mxu0 %v369_v9 }
  0x47   : > { %415 = vmatpush.msrb.mxu0 %v368_v10 }
  0x49   : > { %416 = vmatpush.msrb.mxu0 %v367_v11 }
  0x4b   : > { %417 = vmatpush.msrb.mxu0 %v366_v12 }
  0xa9   : > { %v296_v13 = vpop.f32.mrf.mxu0 }
  0xaa   : > { %v319_v14 = vpop.f32.mrf.mxu1 }
  0xab   : > { %v320_v15 = vadd.f32 %v319_v14, %v296_v13 }
  0xae   : > { %v342_v16 = vpop.f32.mrf.mxu2 }
  0xaf   : > { %v343_v17 = vadd.f32 %v342_v16, %v320_v15 }
  0xb1   : > { %348 = vst [vmem:[%s204_s6] sm:$0xff] %v343_v17  ;;  %v299_v18 = vpop.f32.mrf.mxu0  ;;  %v357_v23 = vmul.f32 %v343_v17, %v343_v17 }
  0xb2   : > { %v322_v19 = vpop.f32.mrf.mxu1 }
  0xb3   : > { %v323_v20 = vadd.f32 %v322_v19, %v299_v18 }
  0xb6   : > { %v345_v21 = vpop.f32.mrf.mxu2 }
  0xb7   : > { %v346_v22 = vadd.f32 %v345_v21, %v323_v20 }
  0xb9   : > { %349 = vst [vmem:[%s204_s6 + $0x8] sm:$0xff] %v346_v22  ;;  %v350_v24 = vadd.f32 %v346_v22, %v343_v17  ;;  %v358_v25 = vmul.f32 %v346_v22, %v346_v22 }
  0xbb   : > { %v351_v26 = vrot.slane %v350_v24, 4  ;;  %v359_v27 = vadd.f32 %v358_v25, %v357_v23 }
  0xbd   : > { %v360_v28 = vrot.slane %v359_v27, 4  ;;  %v352_v29 = vadd.f32 %v351_v26, %v350_v24 }
  0xbf   : > { %v353_v30 = vrot.slane %v352_v29, 2  ;;  %v361_v31 = vadd.f32 %v360_v28, %v359_v27 }
  0xc1   : > { %v354_v32 = vadd.f32 %v353_v30, %v352_v29  ;;  %v362_v33 = vrot.slane %v361_v31, 2 }
  0xc3   : > { %v355_v34 = vrot.slane %v354_v32, 1  ;;  %v363_v35 = vadd.f32 %v362_v33, %v361_v31 }
  0xc5   : > { %v356_v36 = vadd.f32 %v355_v34, %v354_v32  ;;  %v364_v37 = vrot.slane %v363_v35, 1 }
  0xc7   : > { %398 = vmatmul.f32.vlgmr.msra.gmra.mxu3 %v356_v36  ;;  %v365_v38 = vadd.f32 %v364_v37, %v363_v35 }
  0xc9   : > { %418 = vmatmul.f32.vlgmr.msrb.gmra.mxu0 %v365_v38 }
 0x146   : > { %v419_v39 = vpop.f32.mrf.mxu0 }
 0x147   : > { %v423_v40 = vrot.slane %v419_v39, 7 }
 0x14a   : > { %v399_v41 = vpop.f32.mrf.mxu3 }
 0x14b   : > { %v426_v42 = vsel %vm425_vm2, %v399_v41, %v423_v40 }
 0x14c   : > { %427 = vst [vmem:[%s208_s10] sm:$0x3] %v426_v42 }
 0x14d PF: > { %s15_s15 = sadd.s32 1, %s541_s15  }
 0x14e   : > { %p12_p4 = scmp.ge.s32.totalorder %s15_s15, 4  }
 0x150   :  { %14 = sbr.rel (!%p12_p4) target bundleno = 1 (0x1), region = 74 }

// kernel: residual_block_forward.4
= control target key start
LH: loop header
LB: loop body
LE: loop exit
PB: predicated region body
PF: predicated region fallthrough
CT: control target
= control target key end

     0   :  { %s864_s11 = smov 0   ;;  %s1163_s0 = inlined_call_operand.vmem [shape: f32[2,16,128], index: 0, kind: input, shape index: {}]   ;;  %s1164_s1 = inlined_call_operand.vmem [shape: f32[2,2,128], index: 1, kind: input, shape index: {}]   ;;  %s1165_s2 = inlined_call_operand.vmem [shape: f32[1,128], index: 2, kind: input, shape index: {}]   ;;  %s1166_s3 = inlined_call_operand.vmem [shape: f32[1,128], index: 3, kind: input, shape index: {}]   ;;  %s1167_s4 = inlined_call_operand.<no memory space> [shape: f32[1], index: 4, kind: input, shape index: {}]   ;;  %s1168_s5 = inlined_call_operand.vmem [shape: f32[128,128], index: 5, kind: input, shape index: {}]   ;;  %s1169_s6 = inlined_call_operand.vmem [shape: f32[384,128], index: 6, kind: input, shape index: {}]   ;;  %s1170_s7 = inlined_call_operand.vmem [shape: f32[128,128], index: 7, kind: input, shape index: {}]   ;;  %s1171_s8 = inlined_call_operand.vmem [shape: f32[2,16,128], index: 8, kind: output, shape index: {0}]   ;;  %s1172_s9 = inlined_call_operand.vmem [shape: f32[2,2,128], index: 9, kind: output, shape index: {1}]  }
   0x1   :  { %15 = sst [smem:[#allocation2]] %s1167_s4 }
   0x2 LB: > { %s761_s12 = sadd.s32 4294967295, %s809_s11   ;;  %p765_p0 = scmp.ge.s32.totalorder %s809_s11, 1  ;;  %s809_s11 = sphi %s864_s11, %s21_s11  }
   0x3   : > { %p291_p1 = scmp.lt.s32.totalorder %s809_s11, 3 }
   0x5   : > { %p292_p2 = pnand %p765_p0, %p291_p1 }
   0x6   : > { %p331_p3 = scmp.lt.s32.totalorder (!%p292_p2), %s761_s12, 1  ;;  %s442_s13 = sld [smem:[#allocation2]] (!%p292_p2) }
   0x7   : > { %295 = sbr.rel (%p292_p2) target bundleno = 501 (0x1f5), region = 52 }
   0xc   : > { %v393_v0 = vld [vmem:[%s1168_s5 + $0x78] sm:$0xff]  ;;  %v392_v1 = vld [vmem:[%s1168_s5 + $0x70] sm:$0xff]  ;;  %v391_v2 = vld [vmem:[%s1168_s5 + $0x68] sm:$0xff]  ;;  %vm347_vm0 = vcmask 1041408   ;;  %s1174_s12 = smov (!%p331_p3, %s761_s12), 1  ;;  %vm452_vm4 = vcmask 1040384  }
   0xd   : > { %394 = vmatpush.msra.mxu0 %v393_v0  ;;  %414 = vmatpush.msra.mxu1 %v393_v0  ;;  %v390_v3 = vld [vmem:[%s1168_s5 + $0x60] sm:$0xff]  ;;  %v389_v6 = vld [vmem:[%s1168_s5 + $0x58] sm:$0xff]  ;;  %v388_v10 = vld [vmem:[%s1168_s5 + $0x50] sm:$0xff]  ;;  %s775_s28 = sshll.u32 %s1174_s12, 4  ;;  %vm463_vm8 = vcmask 1046528   ;;  %vm471_vm9 = vcmask 1045504  }
   0xe   : > { %v345_v4 = vld [vmem:[%s1164_s1] sm:$0x3]  ;;  %v346_v5 = vld [vmem:[%s1164_s1 + $0x2] sm:$0x3]  ;;  %v387_v12 = vld [vmem:[%s1168_s5 + $0x48] sm:$0xff]  ;;  %s335_s10 = scalar_lea.vmem %s1163_s0, %s775_s28  ;;  %s340_s29 = scalar_lea.vmem %s1171_s8, %s775_s28 }
   0xf   : > { %395 = vmatpush.msra.mxu0 %v392_v1  ;;  %415 = vmatpush.msra.mxu1 %v392_v1  ;;  %v348_v7 = vsel %vm347_vm0, %v345_v4, 0.0  ;;  %v349_v8 = vsel %vm347_vm0, %v346_v5, 0.0  ;;  %v386_v14 = vld [vmem:[%s1168_s5 + $0x40] sm:$0xff]  ;;  %v385_v16 = vld [vmem:[%s1168_s5 + $0x38] sm:$0xff]  ;;  %v384_v18 = vld [vmem:[%s1168_s5 + $0x30] sm:$0xff]  ;;  %s770_s28 = sshll.u32 %s1174_s12, 1 }
  0x10   : > { %v350_v9 = vadd.f32 %v349_v8, %v348_v7  ;;  %v383_v20 = vld [vmem:[%s1168_s5 + $0x28] sm:$0xff]  ;;  %v510_v21 = vld [vmem:[%s1169_s6 + $0xf8] sm:$0xff]  ;;  %v509_v22 = vld [vmem:[%s1169_s6 + $0xf0] sm:$0xff] }
  0x11   : > { %396 = vmatpush.msra.mxu0 %v391_v2  ;;  %416 = vmatpush.msra.mxu1 %v391_v2  ;;  %v382_v23 = vld [vmem:[%s1168_s5 + $0x20] sm:$0xff]  ;;  %v508_v24 = vld [vmem:[%s1169_s6 + $0xe8] sm:$0xff]  ;;  %v494_v25 = vld [vmem:[%s1169_s6 + $0x78] sm:$0xff] }
  0x12   : > { %v896_v11 = vmul.f32 0.001953125, %v350_v9  ;;  %550 = vmatpush.msra.mxu3 %v510_v21  ;;  %v493_v26 = vld [vmem:[%s1169_s6 + $0x70] sm:$0xff]  ;;  %v381_v27 = vld [vmem:[%s1168_s5 + $0x18] sm:$0xff]  ;;  %527 = vmatpush.msra.mxu2 %v494_v25  ;;  %v507_v28 = vld [vmem:[%s1169_s6 + $0xe0] sm:$0xff] }
  0x13   : > { %397 = vmatpush.msra.mxu0 %v390_v3  ;;  %417 = vmatpush.msra.mxu1 %v390_v3  ;;  %v492_v29 = vld [vmem:[%s1169_s6 + $0x68] sm:$0xff]  ;;  %v380_v30 = vld [vmem:[%s1168_s5 + $0x10] sm:$0xff]  ;;  %v506_v32 = vld [vmem:[%s1169_s6 + $0xd8] sm:$0xff] }
  0x14   : > { %v352_v13 = vmul.f32 %v896_v11, %v896_v11  ;;  %551 = vmatpush.msra.mxu3 %v509_v22  ;;  %528 = vmatpush.msra.mxu2 %v493_v26  ;;  %v491_v33 = vld [vmem:[%s1169_s6 + $0x60] sm:$0xff]  ;;  %v379_v34 = vld [vmem:[%s1168_s5 + $0x8] sm:$0xff]  ;;  %v505_v36 = vld [vmem:[%s1169_s6 + $0xd0] sm:$0xff] }
  0x15   : > { %398 = vmatpush.msra.mxu0 %v389_v6  ;;  %418 = vmatpush.msra.mxu1 %v389_v6  ;;  %v490_v37 = vld [vmem:[%s1169_s6 + $0x58] sm:$0xff]  ;;  %v378_v38 = vld [vmem:[%s1168_s5] sm:$0xff]  ;;  %v504_v40 = vld [vmem:[%s1169_s6 + $0xc8] sm:$0xff] }
  0x16   : > { %v354_v15 = vrot.slane %v352_v13, 7  ;;  %552 = vmatpush.msra.mxu3 %v508_v24  ;;  %529 = vmatpush.msra.mxu2 %v492_v29  ;;  %v970_v41 = vld [vmem:[%s1169_s6 + $0x178] sm:$0xff]  ;;  %v489_v43 = vld [vmem:[%s1169_s6 + $0x50] sm:$0xff]  ;;  %v503_v44 = vld [vmem:[%s1169_s6 + $0xc0] sm:$0xff] }
  0x17   : > { %399 = vmatpush.msra.mxu0 %v388_v10  ;;  %419 = vmatpush.msra.mxu1 %v388_v10  ;;  %v525_v45 = vld [vmem:[%s1169_s6 + $0x170] sm:$0xff]  ;;  %v488_v47 = vld [vmem:[%s1169_s6 + $0x48] sm:$0xff]  ;;  %v502_v48 = vld [vmem:[%s1169_s6 + $0xb8] sm:$0xff] }
  0x18   : > { %v356_v17 = vsub.f32 %v896_v11, %v354_v15  ;;  %553 = vmatpush.msra.mxu3 %v507_v28  ;;  %530 = vmatpush.msra.mxu2 %v491_v33  ;;  %v524_v49 = vld [vmem:[%s1169_s6 + $0x168] sm:$0xff]  ;;  %v487_v51 = vld [vmem:[%s1169_s6 + $0x40] sm:$0xff]  ;;  %v501_v52 = vld [vmem:[%s1169_s6 + $0xb0] sm:$0xff] }
  0x19   : > { %400 = vmatpush.msra.mxu0 %v387_v12  ;;  %420 = vmatpush.msra.mxu1 %v387_v12  ;;  %v523_v53 = vld [vmem:[%s1169_s6 + $0x160] sm:$0xff]  ;;  %v486_v55 = vld [vmem:[%s1169_s6 + $0x38] sm:$0xff]  ;;  %v500_v56 = vld [vmem:[%s1169_s6 + $0xa8] sm:$0xff] }
  0x1a   : > { %v358_v19 = vadd.f32 1e-05, %v356_v17  ;;  %554 = vmatpush.msra.mxu3 %v506_v32  ;;  %531 = vmatpush.msra.mxu2 %v490_v37  ;;  %v522_v57 = vld [vmem:[%s1169_s6 + $0x158] sm:$0xff]  ;;  %v485_v58 = vld [vmem:[%s1169_s6 + $0x30] sm:$0xff]  ;;  %v499_v59 = vld [vmem:[%s1169_s6 + $0xa0] sm:$0xff] }
  0x1b   : > { %401 = vmatpush.msra.mxu0 %v386_v14  ;;  %421 = vmatpush.msra.mxu1 %v386_v14  ;;  %v521_v60 = vld [vmem:[%s1169_s6 + $0x150] sm:$0xff]  ;;  %v498_v61 = vld [vmem:[%s1169_s6 + $0x98] sm:$0xff]  ;;  %v520_v62 = vld [vmem:[%s1169_s6 + $0x148] sm:$0xff] }
  0x1c   : > { %801 = vrsqrt.f32 %v358_v19  ;;  %vm365_vm1 = vweird.f32 %v358_v19  ;;  %555 = vmatpush.msra.mxu3 %v505_v36  ;;  %532 = vmatpush.msra.mxu2 %v489_v43  ;;  %v357_v63 = vld [vmem:[%s1165_s2] sm:$0x1]  ;;  %v497_v0 = vld [vmem:[%s1169_s6 + $0x90] sm:$0xff]  ;;  %v496_v4 = vld [vmem:[%s1169_s6 + $0x88] sm:$0xff] }
  0x1d   : > { %402 = vmatpush.msra.mxu0 %v385_v16  ;;  %422 = vmatpush.msra.mxu1 %v385_v16  ;;  %v519_v1 = vld [vmem:[%s1169_s6 + $0x140] sm:$0xff]  ;;  %v484_v9 = vld [vmem:[%s1169_s6 + $0x28] sm:$0xff]  ;;  %v518_v10 = vld [vmem:[%s1169_s6 + $0x138] sm:$0xff] }
  0x1e   : > { %556 = vmatpush.msra.mxu3 %v504_v40  ;;  %533 = vmatpush.msra.mxu2 %v488_v47  ;;  %v375_v5 = vld [vmem:[%s1166_s3] sm:$0x1]  ;;  %v517_v12 = vld [vmem:[%s1169_s6 + $0x130] sm:$0xff]  ;;  %v482_v13 = vld [vmem:[%s1169_s6 + $0x18] sm:$0xff] }
  0x1f   : > { %403 = vmatpush.msra.mxu0 %v384_v18  ;;  %423 = vmatpush.msra.mxu1 %v384_v18  ;;  %v495_v8 = vld [vmem:[%s1169_s6 + $0x80] sm:$0xff]  ;;  %v516_v14 = vld [vmem:[%s1169_s6 + $0x128] sm:$0xff]  ;;  %v481_v15 = vld [vmem:[%s1169_s6 + $0x10] sm:$0xff] }
  0x20   : > { %557 = vmatpush.msra.mxu3 %v503_v44  ;;  %534 = vmatpush.msra.mxu2 %v487_v51  ;;  %v515_v16 = vld [vmem:[%s1169_s6 + $0x120] sm:$0xff]  ;;  %v480_v17 = vld [vmem:[%s1169_s6 + $0x8] sm:$0xff]  ;;  %v514_v18 = vld [vmem:[%s1169_s6 + $0x118] sm:$0xff] }
  0x21   : > { %404 = vmatpush.msra.mxu0 %v383_v20  ;;  %424 = vmatpush.msra.mxu1 %v383_v20  ;;  %v513_v20 = vld [vmem:[%s1169_s6 + $0x110] sm:$0xff]  ;;  %v512_v21 = vld [vmem:[%s1169_s6 + $0x108] sm:$0xff]  ;;  %v511_v22 = vld [vmem:[%s1169_s6 + $0x100] sm:$0xff] }
  0x22   : > { %v802_v31 = vpop.eup %801  ;;  %558 = vmatpush.msra.mxu3 %v502_v48  ;;  %535 = vmatpush.msra.mxu2 %v486_v55  ;;  %v434_v24 = vld [vmem:[%s335_s10] sm:$0xff]  ;;  %v435_v25 = vld [vmem:[%s335_s10 + $0x8] sm:$0xff]  ;;  %vm771_vm7 = vmneg %vm452_vm4 }
  0x23   : > { %405 = vmatpush.msra.mxu0 %v382_v23  ;;  %425 = vmatpush.msra.mxu1 %v382_v23  ;;  %v360_v35 = vmul.f32 %v802_v31, %v358_v19  ;;  %vm366_vm2 = vweird.f32 %v802_v31  ;;  %v479_v19 = vld [vmem:[%s1169_s6] sm:$0xff]  ;;  %v627_v55 = vld [vmem:[%s1170_s7 + $0x68] sm:$0xff] }
  0x24   : > { %vm367_vm3 = vmor %vm365_vm1, %vm366_vm2  ;;  %559 = vmatpush.msra.mxu3 %v501_v52  ;;  %536 = vmatpush.msra.mxu2 %v485_v58  ;;  %v624_v58 = vld [vmem:[%s1170_s7 + $0x50] sm:$0xff] }
  0x25   : > { %406 = vmatpush.msra.mxu0 %v381_v27  ;;  %426 = vmatpush.msra.mxu1 %v381_v27  ;;  %v361_v39 = vmul.f32 %v802_v31, %v360_v35 }
  0x26   : > { %560 = vmatpush.msra.mxu3 %v500_v56  ;;  %537 = vmatpush.msra.mxu2 %v484_v9  ;;  %v626_v56 = vld [vmem:[%s1170_s7 + $0x60] sm:$0xff] }
  0x27   : > { %407 = vmatpush.msra.mxu0 %v380_v30  ;;  %427 = vmatpush.msra.mxu1 %v380_v30  ;;  %v362_v42 = vmul.f32 0.5, %v361_v39 }
  0x28   : > { %561 = vmatpush.msra.mxu3 %v499_v59  ;;  %v623_v59 = vld [vmem:[%s1170_s7 + $0x48] sm:$0xff] }
  0x29   : > { %408 = vmatpush.msra.mxu0 %v379_v34  ;;  %428 = vmatpush.msra.mxu1 %v379_v34  ;;  %v363_v46 = vsub.f32 1.5, %v362_v42 }
  0x2a   : > { %562 = vmatpush.msra.mxu3 %v498_v61  ;;  %v621_v61 = vld [vmem:[%s1170_s7 + $0x38] sm:$0xff] }
  0x2b   : > { %409 = vmatpush.msra.mxu0 %v378_v38  ;;  %429 = vmatpush.msra.mxu1 %v378_v38  ;;  %v364_v50 = vmul.f32 %v802_v31, %v363_v46 }
  0x2c   : > { %563 = vmatpush.msra.mxu3 %v497_v0  ;;  %v618_v0 = vld [vmem:[%s1170_s7 + $0x20] sm:$0xff] }
  0x2d   : > { %573 = vmatpush.msrb.mxu0 %v970_v41  ;;  %v368_v54 = vsel %vm367_vm3, %v802_v31, %v364_v50  ;;  %v445_v31 = vstv %s442_s13  ;;  %s344_s13 = scalar_lea.vmem %s1172_s9, %s770_s28 }
  0x2e   : > { %370 = vst [vmem:[#allocation1] sm:$0xff] %v368_v54  ;;  %564 = vmatpush.msra.mxu3 %v496_v4  ;;  %v628_v54 = vld [vmem:[%s1170_s7 + $0x70] sm:$0xff]  ;;  %v614_v4 = vld [vmem:[%s1170_s7] sm:$0xff] }
  0x2f   : > { %574 = vmatpush.msrb.mxu0 %v525_v45 }
  0x30   : > { %565 = vmatpush.msra.mxu3 %v495_v8 }
  0x31   : > { %575 = vmatpush.msrb.mxu0 %v524_v49 }
  0x32   : > { %777 = vmatpush.msrb.mxu3 %v970_v41 }
  0x33   : > { %576 = vmatpush.msrb.mxu0 %v523_v53 }
  0x34   : > { %778 = vmatpush.msrb.mxu3 %v525_v45 }
  0x35   : > { %577 = vmatpush.msrb.mxu0 %v522_v57  ;;  %v372_v2 = vld [vmem:[#allocation1 + $0x1] ss:$9 sm:$0xff] }
  0x36   : > { %v374_v3 = vmul.f32 %v372_v2, %v357_v63  ;;  %779 = vmatpush.msrb.mxu3 %v524_v49  ;;  %v619_v63 = vld [vmem:[%s1170_s7 + $0x28] sm:$0xff]  ;;  %v616_v2 = vld [vmem:[%s1170_s7 + $0x10] sm:$0xff] }
  0x37   : > { %578 = vmatpush.msrb.mxu0 %v521_v60 }
  0x38   : > { %410 = vmatmul.f32.vlgmr.msra.gmra.mxu0 %v374_v3  ;;  %v376_v6 = vmul.f32 %v374_v3, %v896_v11  ;;  %v483_v11 = vld [vmem:[%s1169_s6 + $0x20] sm:$0xff]  ;;  %780 = vmatpush.msrb.mxu3 %v523_v53  ;;  %v629_v53 = vld [vmem:[%s1170_s7 + $0x78] sm:$0xff]  ;;  %v615_v3 = vld [vmem:[%s1170_s7 + $0x8] sm:$0xff] }
  0x39   : > { %579 = vmatpush.msrb.mxu0 %v520_v62  ;;  %538 = vmatpush.msra.mxu2 %v483_v11 }
  0x3a   : > { %v377_v7 = vsub.f32 %v375_v5, %v376_v6  ;;  %781 = vmatpush.msrb.mxu3 %v522_v57  ;;  %630 = vmatpush.msrb.mxu1 %v629_v53  ;;  %v625_v57 = vld [vmem:[%s1170_s7 + $0x58] sm:$0xff] }
  0x3b   : > { %580 = vmatpush.msrb.mxu0 %v519_v1  ;;  %539 = vmatpush.msra.mxu2 %v482_v13 }
  0x3c   : > { %430 = vmatmul.f32.vlgmr.msra.gmra.mxu1 %v377_v7  ;;  %782 = vmatpush.msrb.mxu3 %v521_v60  ;;  %v622_v60 = vld [vmem:[%s1170_s7 + $0x40] sm:$0xff] }
  0x3d   : > { %581 = vmatpush.msrb.mxu0 %v518_v10  ;;  %540 = vmatpush.msra.mxu2 %v481_v15 }
  0x3e   : > { %783 = vmatpush.msrb.mxu3 %v520_v62  ;;  %631 = vmatpush.msrb.mxu1 %v628_v54  ;;  %v620_v62 = vld [vmem:[%s1170_s7 + $0x30] sm:$0xff] }
  0x3f   : > { %582 = vmatpush.msrb.mxu0 %v517_v12  ;;  %541 = vmatpush.msra.mxu2 %v480_v17 }
  0x40   : > { %784 = vmatpush.msrb.mxu3 %v519_v1  ;;  %632 = vmatpush.msrb.mxu1 %v627_v55  ;;  %v617_v1 = vld [vmem:[%s1170_s7 + $0x18] sm:$0xff] }
  0x41   : > { %583 = vmatpush.msrb.mxu0 %v516_v14  ;;  %542 = vmatpush.msra.mxu2 %v479_v19 }
  0x42   : > { %785 = vmatpush.msrb.mxu3 %v518_v10  ;;  %633 = vmatpush.msrb.mxu1 %v626_v56 }
  0x43   : > { %584 = vmatpush.msrb.mxu0 %v515_v16  ;;  %650 = vmatpush.msrb.mxu2 %v629_v53 }
  0x44   : > { %786 = vmatpush.msrb.mxu3 %v517_v12  ;;  %634 = vmatpush.msrb.mxu1 %v625_v57 }
  0x45   : > { %585 = vmatpush.msrb.mxu0 %v514_v18  ;;  %651 = vmatpush.msrb.mxu2 %v628_v54 }
  0x46   : > { %787 = vmatpush.msrb.mxu3 %v516_v14  ;;  %635 = vmatpush.msrb.mxu1 %v624_v58 }
  0x47   : > { %586 = vmatpush.msrb.mxu0 %v513_v20  ;;  %652 = vmatpush.msrb.mxu2 %v627_v55 }
  0x48   : > { %788 = vmatpush.msrb.mxu3 %v515_v16  ;;  %636 = vmatpush.msrb.mxu1 %v623_v59 }
  0x49   : > { %587 = vmatpush.msrb.mxu0 %v512_v21  ;;  %653 = vmatpush.msrb.mxu2 %v626_v56 }
  0x4a   : > { %789 = vmatpush.msrb.mxu3 %v514_v18  ;;  %637 = vmatpush.msrb.mxu1 %v622_v60 }
  0x4b   : > { %588 = vmatpush.msrb.mxu0 %v511_v22  ;;  %654 = vmatpush.msrb.mxu2 %v625_v57 }
  0x4c   : > { %790 = vmatpush.msrb.mxu3 %v513_v20  ;;  %638 = vmatpush.msrb.mxu1 %v621_v61 }
  0x4d   : > { %655 = vmatpush.msrb.mxu2 %v624_v58 }
  0x4e   : > { %791 = vmatpush.msrb.mxu3 %v512_v21  ;;  %639 = vmatpush.msrb.mxu1 %v620_v62 }
  0x4f   : > { %656 = vmatpush.msrb.mxu2 %v623_v59 }
  0x50   : > { %792 = vmatpush.msrb.mxu3 %v511_v22  ;;  %640 = vmatpush.msrb.mxu1 %v619_v63 }
  0x51   : > { %657 = vmatpush.msrb.mxu2 %v622_v60 }
  0x52   : > { %641 = vmatpush.msrb.mxu1 %v618_v0 }
  0x53   : > { %658 = vmatpush.msrb.mxu2 %v621_v61 }
  0x54   : > { %642 = vmatpush.msrb.mxu1 %v617_v1 }
  0x55   : > { %659 = vmatpush.msrb.mxu2 %v620_v62 }
  0x56   : > { %643 = vmatpush.msrb.mxu1 %v616_v2 }
  0x57   : > { %660 = vmatpush.msrb.mxu2 %v619_v63 }
  0x58   : > { %644 = vmatpush.msrb.mxu1 %v615_v3 }
  0x59   : > { %661 = vmatpush.msrb.mxu2 %v618_v0 }
  0x5a   : > { %645 = vmatpush.msrb.mxu1 %v614_v4 }
  0x5b   : > { %662 = vmatpush.msrb.mxu2 %v617_v1 }
  0x5d   : > { %663 = vmatpush.msrb.mxu2 %v616_v2 }
  0x5f   : > { %664 = vmatpush.msrb.mxu2 %v615_v3 }
  0x61   : > { %665 = vmatpush.msrb.mxu2 %v614_v4 }
  0xb5   : > { %v411_v23 = vpop.f32.mrf.mxu0 }
  0xb6   : > { %v436_v26 = vperm.slane %v411_v23, 0 }
  0xb8   : > { %v437_v27 = vmul.f32 %v436_v26, %v434_v24  ;;  %v438_v28 = vmul.f32 %v436_v26, %v435_v25 }
  0xb9   : > { %v431_v29 = vpop.f32.mrf.mxu1 }
  0xba   : > { %v439_v30 = vperm.slane %v431_v29, 0 }
  0xbc   : > { %v440_v32 = vadd.f32 %v439_v30, %v437_v27  ;;  %v441_v33 = vadd.f32 %v439_v30, %v438_v28 }
  0xbe   : > { %vm444_vm5 = vcmp.ge.f32.partialorder %v441_v33, 0.0  ;;  %v446_v34 = vmul.f32 %v445_v31, %v440_v32  ;;  %v447_v35 = vmul.f32 %v445_v31, %v441_v33  ;;  %vm443_vm6 = vcmp.ge.f32.partialorder %v440_v32, 0.0 }
  0xc0   : > { %v449_v36 = vsel %vm444_vm5, %v441_v33, %v447_v35  ;;  %v448_v37 = vsel %vm443_vm6, %v440_v32, %v446_v34 }
  0xc1   : > { %v454_v38 = vrot.slane %v449_v36, 7  ;;  %v453_v39 = vrot.slane %v448_v37, 7 }
  0xc3   : > { %772 = vmatmul.msk.f32.vlgmr.msra.gmra.mxu2 %vm771_vm7, %v453_v39  ;;  %v455_v40 = vsel %vm452_vm4, %v453_v39, %v454_v38  ;;  %v459_v41 = vsel %vm452_vm4, 0.0, %v453_v39  ;;  %v460_v48 = vsel %vm452_vm4, %v454_v38, 0.0 }
  0xc4   : > { %v464_v42 = vrot.slane %v459_v41, 1  ;;  %v465_v43 = vrot.slane %v455_v40, 1  ;;  %v472_v44 = vrot.slane %v459_v41, 2  ;;  %v473_v45 = vrot.slane %v455_v40, 2 }
  0xc5   : > { %v467_v49 = vrot.slane %v460_v48, 1  ;;  %v475_v51 = vrot.slane %v460_v48, 2 }
  0xc6   : > { %v466_v46 = vsel %vm463_vm8, %v464_v42, %v465_v43  ;;  %v474_v47 = vsel %vm471_vm9, %v472_v44, %v473_v45 }
  0xc7   : > { %566 = vmatmul.f32.vlgmr.msra.gmra.mxu3 %v466_v46  ;;  %589 = vmatmul.f32.vlgmr.msrb.gmra.mxu0 %v474_v47  ;;  %v468_v50 = vsel %vm463_vm8, %v465_v43, %v467_v49  ;;  %v476_v52 = vsel %vm471_vm9, %v473_v45, %v475_v51 }
  0xcb   : > { %546 = vmatmul.f32.gmra.mxu2 %v455_v40 }
  0xcf   : > { %569 = vmatmul.f32.gmra.mxu3 %v468_v50 }
  0xd7   : > { %592 = vmatmul.f32.vlgmr.msrb.gmra.mxu3 %v476_v52 }
 0x144   : > { %v590_v8 = vpop.f32.mrf.mxu0 }
 0x146   : > { %v544_v5 = vpop.f32.mrf.mxu2 }
 0x14a   : > { %v567_v6 = vpop.f32.mrf.mxu3 }
 0x14b   : > { %v568_v7 = vadd.f32 %v567_v6, %v544_v5 }
 0x14d   : > { %v591_v9 = vadd.f32 %v590_v8, %v568_v7 }
 0x14e   : > { %v547_v11 = vpop.f32.mrf.mxu2 }
 0x14f   : > { %596 = vst [vmem:[%s340_s29] sm:$0xff] %v591_v9  ;;  %v605_v15 = vmul.f32 %v591_v9, %v591_v9 }
 0x152   : > { %v570_v10 = vpop.f32.mrf.mxu3 }
 0x153   : > { %v571_v12 = vadd.f32 %v570_v10, %v547_v11 }
 0x15a   : > { %v593_v13 = vpop.f32.mrf.mxu3 }
 0x15b   : > { %v594_v14 = vadd.f32 %v593_v13, %v571_v12 }
 0x15d   : > { %597 = vst [vmem:[%s340_s29 + $0x8] sm:$0xff] %v594_v14  ;;  %v598_v16 = vadd.f32 %v594_v14, %v591_v9  ;;  %v606_v17 = vmul.f32 %v594_v14, %v594_v14 }
 0x15f   : > { %v599_v18 = vrot.slane %v598_v16, 4  ;;  %v607_v19 = vadd.f32 %v606_v17, %v605_v15 }
 0x161   : > { %v600_v20 = vadd.f32 %v599_v18, %v598_v16  ;;  %v608_v21 = vrot.slane %v607_v19, 4 }
 0x163   : > { %v601_v22 = vrot.slane %v600_v20, 2  ;;  %v609_v23 = vadd.f32 %v608_v21, %v607_v19 }
 0x165   : > { %v602_v24 = vadd.f32 %v601_v22, %v600_v20  ;;  %v610_v25 = vrot.slane %v609_v23, 2 }
 0x167   : > { %v603_v26 = vrot.slane %v602_v24, 1  ;;  %v611_v27 = vadd.f32 %v610_v25, %v609_v23 }
 0x169   : > { %v604_v28 = vadd.f32 %v603_v26, %v602_v24  ;;  %v612_v29 = vrot.slane %v611_v27, 1 }
 0x16b   : > { %646 = vmatmul.f32.vlgmr.msrb.gmra.mxu1 %v604_v28  ;;  %v613_v30 = vadd.f32 %v612_v29, %v611_v27 }
 0x16d   : > { %666 = vmatmul.f32.vlgmr.msrb.gmra.mxu2 %v613_v30 }
 0x1e8   : > { %v647_v33 = vpop.f32.mrf.mxu1 }
 0x1f0   : > { %v667_v31 = vpop.f32.mrf.mxu2 }
 0x1f1   : > { %v671_v32 = vrot.slane %v667_v31, 7 }
 0x1f3   : > { %v673_v34 = vsel %vm452_vm4, %v647_v33, %v671_v32 }
 0x1f4   : > { %674 = vst [vmem:[%s344_s13] sm:$0x3] %v673_v34 }
 0x1f5 PF: > { %s21_s11 = sadd.s32 1, %s809_s11  }
 0x1f6   : > { %p18_p4 = scmp.ge.s32.totalorder %s21_s11, 4  }
 0x1f8   :  { %20 = sbr.rel (!%p18_p4) target bundleno = 2 (0x2), region = 95 }

// kernel: residual_block_forward.5
= control target key start
LH: loop header
LB: loop body
LE: loop exit
PB: predicated region body
PF: predicated region fallthrough
CT: control target
= control target key end

     0   :  { %s511_s21 = smov 0   ;;  %s595_s0 = inlined_call_operand.vmem [shape: f32[2,16,128], index: 0, kind: input, shape index: {}]   ;;  %s596_s1 = inlined_call_operand.vmem [shape: f32[2,2,128], index: 1, kind: input, shape index: {}]   ;;  %s597_s2 = inlined_call_operand.vmem [shape: f32[1,128], index: 2, kind: input, shape index: {}]   ;;  %s598_s3 = inlined_call_operand.vmem [shape: f32[1,128], index: 3, kind: input, shape index: {}]   ;;  %s599_s4 = inlined_call_operand.vmem [shape: f32[128,128], index: 4, kind: input, shape index: {}]   ;;  %s600_s5 = inlined_call_operand.vmem [shape: f32[2,16,128], index: 5, kind: input, shape index: {}]   ;;  %s601_s6 = inlined_call_operand.vmem [shape: f32[2,16,128], index: 6, kind: output, shape index: {}]  }
   0x1 LB: > { %s442_s22 = sadd.s32 4294967295, %s474_s21   ;;  %p446_p0 = scmp.ge.s32.totalorder %s474_s21, 1  ;;  %s474_s21 = sphi %s511_s21, %s16_s21  }
   0x2   : > { %p222_p1 = scmp.lt.s32.totalorder %s474_s21, 3 }
   0x4   : > { %p223_p2 = pnand %p446_p0, %p222_p1 }
   0x5   : > { %p257_p3 = scmp.lt.s32.totalorder (!%p223_p2), %s442_s22, 1 }
   0x6   : > { %226 = sbr.rel (%p223_p2) target bundleno = 193 (0xc1), region = 44 }
   0xb   : > { %v320_v0 = vld [vmem:[%s599_s4 + $0x78] sm:$0xff]  ;;  %v319_v1 = vld [vmem:[%s599_s4 + $0x70] sm:$0xff]  ;;  %v318_v2 = vld [vmem:[%s599_s4 + $0x68] sm:$0xff]  ;;  %vm274_vm0 = vcmask 1041408   ;;  %s603_s22 = smov (!%p257_p3, %s442_s22), 1 }
   0xc   : > { %321 = vmatpush.msra.mxu0 %v320_v0  ;;  %341 = vmatpush.msra.mxu1 %v320_v0  ;;  %v317_v3 = vld [vmem:[%s599_s4 + $0x60] sm:$0xff]  ;;  %v316_v6 = vld [vmem:[%s599_s4 + $0x58] sm:$0xff]  ;;  %v315_v10 = vld [vmem:[%s599_s4 + $0x50] sm:$0xff]  ;;  %s455_s17 = sshll.u32 %s603_s22, 4 }
   0xd   : > { %v272_v4 = vld [vmem:[%s596_s1] sm:$0x3]  ;;  %v273_v5 = vld [vmem:[%s596_s1 + $0x2] sm:$0x3]  ;;  %v314_v12 = vld [vmem:[%s599_s4 + $0x48] sm:$0xff]  ;;  %s261_s20 = scalar_lea.vmem %s595_s0, %s455_s17  ;;  %s266_s25 = scalar_lea.vmem %s600_s5, %s455_s17 }
   0xe   : > { %322 = vmatpush.msra.mxu0 %v319_v1  ;;  %342 = vmatpush.msra.mxu1 %v319_v1  ;;  %v275_v7 = vsel %vm274_vm0, %v272_v4, 0.0  ;;  %v276_v8 = vsel %vm274_vm0, %v273_v5, 0.0  ;;  %v313_v14 = vld [vmem:[%s599_s4 + $0x40] sm:$0xff]  ;;  %v312_v16 = vld [vmem:[%s599_s4 + $0x38] sm:$0xff]  ;;  %v311_v18 = vld [vmem:[%s599_s4 + $0x30] sm:$0xff]  ;;  %s271_s27 = scalar_lea.vmem %s601_s6, %s455_s17 }
   0xf   : > { %v277_v9 = vadd.f32 %v276_v8, %v275_v7  ;;  %v310_v20 = vld [vmem:[%s599_s4 + $0x28] sm:$0xff]  ;;  %v309_v21 = vld [vmem:[%s599_s4 + $0x20] sm:$0xff]  ;;  %v308_v22 = vld [vmem:[%s599_s4 + $0x18] sm:$0xff] }
  0x10   : > { %323 = vmatpush.msra.mxu0 %v318_v2  ;;  %343 = vmatpush.msra.mxu1 %v318_v2  ;;  %v307_v23 = vld [vmem:[%s599_s4 + $0x10] sm:$0xff]  ;;  %v306_v25 = vld [vmem:[%s599_s4 + $0x8] sm:$0xff]  ;;  %v305_v27 = vld [vmem:[%s599_s4] sm:$0xff] }
  0x11   : > { %v278_v11 = vmul.f32 0.001953125, %v277_v9  ;;  %v284_v33 = vld [vmem:[%s597_s2] sm:$0x1]  ;;  %v362_v41 = vld [vmem:[%s261_s20 + $0x8] sm:$0xff] }
  0x12   : > { %324 = vmatpush.msra.mxu0 %v317_v3  ;;  %344 = vmatpush.msra.mxu1 %v317_v3  ;;  %v302_v36 = vld [vmem:[%s598_s3] sm:$0x1]  ;;  %v370_v48 = vld [vmem:[%s266_s25 + $0x8] sm:$0xff] }
  0x13   : > { %v279_v13 = vmul.f32 %v278_v11, %v278_v11  ;;  %v361_v40 = vld [vmem:[%s261_s20] sm:$0xff] }
  0x14   : > { %325 = vmatpush.msra.mxu0 %v316_v6  ;;  %345 = vmatpush.msra.mxu1 %v316_v6  ;;  %v369_v47 = vld [vmem:[%s266_s25] sm:$0xff] }
  0x15   : > { %v281_v15 = vrot.slane %v279_v13, 7 }
  0x16   : > { %326 = vmatpush.msra.mxu0 %v315_v10  ;;  %346 = vmatpush.msra.mxu1 %v315_v10 }
  0x17   : > { %v283_v17 = vsub.f32 %v278_v11, %v281_v15 }
  0x18   : > { %327 = vmatpush.msra.mxu0 %v314_v12  ;;  %347 = vmatpush.msra.mxu1 %v314_v12 }
  0x19   : > { %v285_v19 = vadd.f32 1e-05, %v283_v17 }
  0x1a   : > { %328 = vmatpush.msra.mxu0 %v313_v14  ;;  %348 = vmatpush.msra.mxu1 %v313_v14 }
  0x1b   : > { %466 = vrsqrt.f32 %v285_v19  ;;  %vm292_vm1 = vweird.f32 %v285_v19 }
  0x1c   : > { %329 = vmatpush.msra.mxu0 %v312_v16  ;;  %349 = vmatpush.msra.mxu1 %v312_v16 }
  0x1e   : > { %330 = vmatpush.msra.mxu0 %v311_v18  ;;  %350 = vmatpush.msra.mxu1 %v311_v18 }
  0x20   : > { %331 = vmatpush.msra.mxu0 %v310_v20  ;;  %351 = vmatpush.msra.mxu1 %v310_v20 }
  0x21   : > { %v467_v24 = vpop.eup %466 }
  0x22   : > { %332 = vmatpush.msra.mxu0 %v309_v21  ;;  %352 = vmatpush.msra.mxu1 %v309_v21  ;;  %v287_v26 = vmul.f32 %v467_v24, %v285_v19  ;;  %vm293_vm2 = vweird.f32 %v467_v24 }
  0x23   : > { %vm294_vm3 = vmor %vm292_vm1, %vm293_vm2 }
  0x24   : > { %333 = vmatpush.msra.mxu0 %v308_v22  ;;  %353 = vmatpush.msra.mxu1 %v308_v22  ;;  %v288_v28 = vmul.f32 %v467_v24, %v287_v26 }
  0x26   : > { %334 = vmatpush.msra.mxu0 %v307_v23  ;;  %354 = vmatpush.msra.mxu1 %v307_v23  ;;  %v289_v29 = vmul.f32 0.5, %v288_v28 }
  0x28   : > { %335 = vmatpush.msra.mxu0 %v306_v25  ;;  %355 = vmatpush.msra.mxu1 %v306_v25  ;;  %v290_v30 = vsub.f32 1.5, %v289_v29 }
  0x2a   : > { %336 = vmatpush.msra.mxu0 %v305_v27  ;;  %356 = vmatpush.msra.mxu1 %v305_v27  ;;  %v291_v31 = vmul.f32 %v467_v24, %v290_v30 }
  0x2c   : > { %v295_v32 = vsel %vm294_vm3, %v467_v24, %v291_v31 }
  0x2d   : > { %297 = vst [vmem:[#allocation1] sm:$0xff] %v295_v32 }
  0x34   : > { %v299_v34 = vld [vmem:[#allocation1 + $0x1] ss:$9 sm:$0xff] }
  0x35   : > { %v301_v35 = vmul.f32 %v299_v34, %v284_v33 }
  0x37   : > { %337 = vmatmul.f32.vlgmr.msra.gmra.mxu0 %v301_v35  ;;  %v303_v37 = vmul.f32 %v301_v35, %v278_v11 }
  0x39   : > { %v304_v38 = vsub.f32 %v302_v36, %v303_v37 }
  0x3b   : > { %357 = vmatmul.f32.vlgmr.msra.gmra.mxu1 %v304_v38 }
  0xb4   : > { %v338_v39 = vpop.f32.mrf.mxu0 }
  0xb5   : > { %v363_v42 = vperm.slane %v338_v39, 0 }
  0xb7   : > { %v364_v43 = vmul.f32 %v363_v42, %v361_v40  ;;  %v365_v44 = vmul.f32 %v363_v42, %v362_v41 }
  0xb8   : > { %v358_v45 = vpop.f32.mrf.mxu1 }
  0xb9   : > { %v366_v46 = vperm.slane %v358_v45, 0 }
  0xbb   : > { %v367_v49 = vadd.f32 %v366_v46, %v364_v43  ;;  %v368_v50 = vadd.f32 %v366_v46, %v365_v44 }
  0xbd   : > { %v371_v51 = vadd.f32 %v369_v47, %v367_v49  ;;  %v372_v52 = vadd.f32 %v370_v48, %v368_v50 }
  0xbf   : > { %373 = vst [vmem:[%s271_s27] sm:$0xff] %v371_v51 }
  0xc0   : > { %374 = vst [vmem:[%s271_s27 + $0x8] sm:$0xff] %v372_v52 }
  0xc1 PF: > { %s16_s21 = sadd.s32 1, %s474_s21  }
  0xc2   : > { %p13_p4 = scmp.ge.s32.totalorder %s16_s21, 4  }
  0xc4   :  { %15 = sbr.rel (!%p13_p4) target bundleno = 1 (0x1), region = 78 }

</bundles_post_ra>
